<compile_context>
chip_gen: v5e
topology: v5e:2x2
jax: 0.10.0
libtpu: 0.0.40
codegen_flags: <defaults>
</compile_context>

<pallas_src>
import jax
import jax.numpy as jnp
from jax.experimental import pallas as pl
from jax.experimental.pallas import tpu as pltpu

LN_EPS = 1e-5


def _round_up(x, m):
    return ((x + m - 1) // m) * m


def reward_kernel(s_ref, s2_ref, a_ref,
                  w1s_ref, w1t_ref, w1a_ref, b1_ref,
                  w2_ref, b2_ref, w3_ref, b3_ref,
                  g1_ref, be1_ref, g2_ref, be2_ref,
                  out_ref):
    # fc1 over the fused concat:
    #   sa @ W1 == state @ W1[:ds] + state_ @ W1[ds:2ds] + action @ W1[2ds:]
    h1 = jnp.dot(s_ref[...], w1s_ref[...], preferred_element_type=jnp.float32)
    h1 = h1 + jnp.dot(s2_ref[...], w1t_ref[...], preferred_element_type=jnp.float32)
    h1 = h1 + jnp.dot(a_ref[...], w1a_ref[...], preferred_element_type=jnp.float32)
    h1 = h1 + b1_ref[...]
    h1 = jnp.maximum(h1, 0.0)

    # LayerNorm(fc1_dims), biased variance, eps=1e-5 (matches PyTorch).
    mu1 = jnp.mean(h1, axis=-1, keepdims=True)
    var1 = jnp.mean((h1 - mu1) ** 2, axis=-1, keepdims=True)
    h1 = (h1 - mu1) * jax.lax.rsqrt(var1 + LN_EPS) * g1_ref[...] + be1_ref[...]

    # fc2 -> ReLU -> LayerNorm(fc2_dims)
    h2 = jnp.dot(h1, w2_ref[...], preferred_element_type=jnp.float32) + b2_ref[...]
    h2 = jnp.maximum(h2, 0.0)
    mu2 = jnp.mean(h2, axis=-1, keepdims=True)
    var2 = jnp.mean((h2 - mu2) ** 2, axis=-1, keepdims=True)
    h2 = (h2 - mu2) * jax.lax.rsqrt(var2 + LN_EPS) * g2_ref[...] + be2_ref[...]

    # fc3: contract the (1, F2) weight row against h2's feature axis so the
    # per-row reward lands lane-dense as a (1, block_m) row (no N=1 matmul,
    # no masked width-1 stores).
    out_row = jax.lax.dot_general(
        w3_ref[...], h2, (((1,), (1,)), ((), ())),
        preferred_element_type=jnp.float32) + b3_ref[...]
    out_ref[0] = out_row.astype(out_ref.dtype)


def reward_network_forward(state, state_, action, params, *, block_m=512):
    w1, b1, w2, b2, w3r, b3, g1, be1, g2, be2 = params
    state = state.astype(jnp.float32)
    state_ = state_.astype(jnp.float32)
    action = action.astype(jnp.float32)

    B, d_s = state.shape
    d_a = action.shape[1]
    F1 = w1.shape[1]
    F2 = w2.shape[1]
    d_in = 2 * d_s + d_a

    # Lane-dense output puts the batch tile on the lane axis, so the tile (and
    # the batch padding) is a multiple of 128.  The cap keeps several grid steps
    # for large batches (megacore sharding on v7x); tiny batches collapse to a
    # single grid step.
    block_m = max(128, min(_round_up(block_m, 128), _round_up(B, 128)))
    B_pad = _round_up(B, block_m)
    n_blk = B_pad // block_m

    if B_pad != B:
        pad = ((0, B_pad - B), (0, 0))
        state = jnp.pad(state, pad)
        state_ = jnp.pad(state_, pad)
        action = jnp.pad(action, pad)

    # Split fc1's weight by input rows: fuses cat([state, state_, action]) into
    # three accumulating matmuls inside the kernel (no sa tensor through HBM).
    w1s = w1[:d_s]
    w1t = w1[d_s:2 * d_s]
    w1a = w1[2 * d_s:]

    # Small constants: whole-array VMEM residents, DMA'd once, no per-step
    # block pipelining / double buffering.
    def vmem():
        return pl.BlockSpec(memory_space=pltpu.MemorySpace.VMEM)

    weight_elems = d_in * F1 + F1 * F2 + F2 + F1 + F2 + 1 + 2 * F1 + 2 * F2
    cost = pl.CostEstimate(
        flops=int(2 * B_pad * (d_in * F1 + F1 * F2 + F2) + 10 * B_pad * (F1 + F2)),
        transcendentals=int(2 * B_pad),
        bytes_accessed=int(4 * (B_pad * (d_in + 1) + weight_elems)),
    )

    out = pl.pallas_call(
        reward_kernel,
        out_shape=jax.ShapeDtypeStruct((n_blk, 1, block_m), jnp.float32),
        grid_spec=pltpu.PrefetchScalarGridSpec(
            num_scalar_prefetch=0,
            grid=(n_blk,),
            in_specs=[
                pl.BlockSpec((block_m, d_s), lambda i: (i, 0)),  # state tile
                pl.BlockSpec((block_m, d_s), lambda i: (i, 0)),  # state_ tile
                pl.BlockSpec((block_m, d_a), lambda i: (i, 0)),  # action tile
                vmem(),   # w1 rows for state
                vmem(),   # w1 rows for state_
                vmem(),   # w1 rows for action
                vmem(),   # b1
                vmem(),   # w2
                vmem(),   # b2
                vmem(),   # w3 row (1, F2)
                vmem(),   # b3
                vmem(),   # ln1 gamma
                vmem(),   # ln1 beta
                vmem(),   # ln2 gamma
                vmem(),   # ln2 beta
            ],
            out_specs=pl.BlockSpec((1, 1, block_m), lambda i: (i, 0, 0)),
        ),
        compiler_params=pltpu.CompilerParams(
            dimension_semantics=("parallel",)),
        cost_estimate=cost,
    )(state, state_, action, w1s, w1t, w1a, b1, w2, b2, w3r, b3, g1, be1, g2, be2)

    # (n_blk, 1, block_m) -> (B_pad, 1) preserves batch order; drop the padding.
    return out.reshape(B_pad, 1)[:B]


def init_params(key, input_dims, n_actions, fc1_dims, fc2_dims):
    """Deterministic init mirroring nn.Linear default (uniform +-1/sqrt(fan_in));
    LayerNorm affine = (gamma=1, beta=0). fc1/fc2 weights stored as (in, out);
    fc3 weight stored as a (1, fc2_dims) row."""
    d_in = 2 * input_dims + n_actions
    ks = jax.random.split(key, 6)

    def lin(kw, kb, fan_in, fan_out):
        bound = 1.0 / jnp.sqrt(fan_in)
        w = jax.random.uniform(kw, (fan_in, fan_out), jnp.float32, -bound, bound)
        b = jax.random.uniform(kb, (1, fan_out), jnp.float32, -bound, bound)
        return w, b

    w1, b1 = lin(ks[0], ks[1], d_in, fc1_dims)
    w2, b2 = lin(ks[2], ks[3], fc1_dims, fc2_dims)
    bound3 = 1.0 / jnp.sqrt(fc2_dims)
    w3r = jax.random.uniform(ks[4], (1, fc2_dims), jnp.float32, -bound3, bound3)
    b3 = jax.random.uniform(ks[5], (1, 1), jnp.float32, -bound3, bound3)
    g1 = jnp.ones((1, fc1_dims), jnp.float32)
    be1 = jnp.zeros((1, fc1_dims), jnp.float32)
    g2 = jnp.ones((1, fc2_dims), jnp.float32)
    be2 = jnp.zeros((1, fc2_dims), jnp.float32)
    return (w1, b1, w2, b2, w3r, b3, g1, be1, g2, be2)


def reward_network_ref(state, state_, action, params):
    """Pure-JAX reference for correctness checking."""
    w1, b1, w2, b2, w3r, b3, g1, be1, g2, be2 = params
    sa = jnp.concatenate([state, state_, action], axis=1)

    def ln(x, g, b):
        mu = jnp.mean(x, axis=-1, keepdims=True)
        var = jnp.mean((x - mu) ** 2, axis=-1, keepdims=True)
        return (x - mu) * jax.lax.rsqrt(var + LN_EPS) * g + b

    h1 = ln(jnp.maximum(sa @ w1 + b1, 0.0), g1, be1)
    h2 = ln(jnp.maximum(h1 @ w2 + b2, 0.0), g2, be2)
    return h2 @ w3r.T + b3


if __name__ == "__main__":
    # Small shapes consistent with the module:
    #   input_dims=(8,), n_actions=4  -> concat dim = 2*8+4 = 20
    #   fc1_dims=32, fc2_dims=32, batch=16
    input_dims, n_actions = 8, 4
    fc1_dims, fc2_dims = 32, 32
    batch = 16

    key = jax.random.PRNGKey(0)
    kp, ks, ks_, ka = jax.random.split(key, 4)

    params = init_params(kp, input_dims, n_actions, fc1_dims, fc2_dims)
    state = jax.random.normal(ks, (batch, input_dims), jnp.float32)
    state_ = jax.random.normal(ks_, (batch, input_dims), jnp.float32)
    action = jax.random.normal(ka, (batch, n_actions), jnp.float32)

    out = reward_network_forward(state, state_, action, params)
    out = jax.block_until_ready(out)

    ref = reward_network_ref(state, state_, action, params)
    assert out.shape == (batch, 1)
    assert jnp.allclose(out, ref, atol=1e-4, rtol=1e-4), "Pallas output mismatch vs reference"

    print("KERNEL_OK")
</pallas_src>

<mosaic_0001>
module attributes {stable_mosaic.version = 11 : i64} {
  func.func @reward_kernel(%arg0: i32, %arg1: memref<128x8xf32, #tpu.memory_space<vmem>>, %arg2: memref<128x8xf32, #tpu.memory_space<vmem>>, %arg3: memref<128x4xf32, #tpu.memory_space<vmem>>, %arg4: memref<8x32xf32, #tpu.memory_space<vmem>>, %arg5: memref<8x32xf32, #tpu.memory_space<vmem>>, %arg6: memref<4x32xf32, #tpu.memory_space<vmem>>, %arg7: memref<1x32xf32, #tpu.memory_space<vmem>>, %arg8: memref<32x32xf32, #tpu.memory_space<vmem>>, %arg9: memref<1x32xf32, #tpu.memory_space<vmem>>, %arg10: memref<1x32xf32, #tpu.memory_space<vmem>>, %arg11: memref<1x1xf32, #tpu.memory_space<vmem>>, %arg12: memref<1x32xf32, #tpu.memory_space<vmem>>, %arg13: memref<1x32xf32, #tpu.memory_space<vmem>>, %arg14: memref<1x32xf32, #tpu.memory_space<vmem>>, %arg15: memref<1x32xf32, #tpu.memory_space<vmem>>, %arg16: memref<1x1x128xf32, #tpu.memory_space<vmem>>) attributes {dimension_semantics = [#tpu.dimension_semantics<parallel>], iteration_bounds = array<i64: 1>, scalar_prefetch = 0 : i64, scratch_operands = 0 : i64, tpu.core_type = #tpu.core_type<tc>, window_params = [{transform_indices = @transform_0, window_bounds = array<i64: 128, 8>}, {transform_indices = @transform_1, window_bounds = array<i64: 128, 8>}, {transform_indices = @transform_2, window_bounds = array<i64: 128, 4>}, {pipeline_mode = #tpu.pipeline_mode<synchronous>, transform_indices = @transform_3, window_bounds = array<i64: 8, 32>}, {pipeline_mode = #tpu.pipeline_mode<synchronous>, transform_indices = @transform_4, window_bounds = array<i64: 8, 32>}, {pipeline_mode = #tpu.pipeline_mode<synchronous>, transform_indices = @transform_5, window_bounds = array<i64: 4, 32>}, {pipeline_mode = #tpu.pipeline_mode<synchronous>, transform_indices = @transform_6, window_bounds = array<i64: 1, 32>}, {pipeline_mode = #tpu.pipeline_mode<synchronous>, transform_indices = @transform_7, window_bounds = array<i64: 32, 32>}, {pipeline_mode = #tpu.pipeline_mode<synchronous>, transform_indices = @transform_8, window_bounds = array<i64: 1, 32>}, {pipeline_mode = #tpu.pipeline_mode<synchronous>, transform_indices = @transform_9, window_bounds = array<i64: 1, 32>}, {pipeline_mode = #tpu.pipeline_mode<synchronous>, transform_indices = @transform_10, window_bounds = array<i64: 1, 1>}, {pipeline_mode = #tpu.pipeline_mode<synchronous>, transform_indices = @transform_11, window_bounds = array<i64: 1, 32>}, {pipeline_mode = #tpu.pipeline_mode<synchronous>, transform_indices = @transform_12, window_bounds = array<i64: 1, 32>}, {pipeline_mode = #tpu.pipeline_mode<synchronous>, transform_indices = @transform_13, window_bounds = array<i64: 1, 32>}, {pipeline_mode = #tpu.pipeline_mode<synchronous>, transform_indices = @transform_14, window_bounds = array<i64: 1, 32>}, {transform_indices = @transform_15, window_bounds = array<i64: 1, 1, 128>}]} {
    %c0 = arith.constant 0 : index
    %c0_0 = arith.constant 0 : index
    %0 = vector.load %arg1[%c0, %c0_0] : memref<128x8xf32, #tpu.memory_space<vmem>>, vector<128x8xf32>
    %c0_1 = arith.constant 0 : index
    %c0_2 = arith.constant 0 : index
    %1 = vector.load %arg4[%c0_1, %c0_2] : memref<8x32xf32, #tpu.memory_space<vmem>>, vector<8x32xf32>
    %cst = arith.constant dense<0.000000e+00> : vector<128x32xf32>
    %2 = tpu.matmul %0, %1, %cst {dimension_numbers = #tpu.dot_dimension_numbers<[1], [0], [0], [1], [0, 0, 1, 1], [], []>} : vector<128x8xf32>, vector<8x32xf32>, vector<128x32xf32> -> vector<128x32xf32>
    %c0_3 = arith.constant 0 : index
    %c0_4 = arith.constant 0 : index
    %3 = vector.load %arg2[%c0_3, %c0_4] : memref<128x8xf32, #tpu.memory_space<vmem>>, vector<128x8xf32>
    %c0_5 = arith.constant 0 : index
    %c0_6 = arith.constant 0 : index
    %4 = vector.load %arg5[%c0_5, %c0_6] : memref<8x32xf32, #tpu.memory_space<vmem>>, vector<8x32xf32>
    %cst_7 = arith.constant dense<0.000000e+00> : vector<128x32xf32>
    %5 = tpu.matmul %3, %4, %cst_7 {dimension_numbers = #tpu.dot_dimension_numbers<[1], [0], [0], [1], [0, 0, 1, 1], [], []>} : vector<128x8xf32>, vector<8x32xf32>, vector<128x32xf32> -> vector<128x32xf32>
    %6 = arith.addf %2, %5 : vector<128x32xf32>
    %c0_8 = arith.constant 0 : index
    %c0_9 = arith.constant 0 : index
    %7 = vector.load %arg3[%c0_8, %c0_9] : memref<128x4xf32, #tpu.memory_space<vmem>>, vector<128x4xf32>
    %c0_10 = arith.constant 0 : index
    %c0_11 = arith.constant 0 : index
    %8 = vector.load %arg6[%c0_10, %c0_11] : memref<4x32xf32, #tpu.memory_space<vmem>>, vector<4x32xf32>
    %cst_12 = arith.constant dense<0.000000e+00> : vector<128x32xf32>
    %9 = tpu.matmul %7, %8, %cst_12 {dimension_numbers = #tpu.dot_dimension_numbers<[1], [0], [0], [1], [0, 0, 1, 1], [], []>} : vector<128x4xf32>, vector<4x32xf32>, vector<128x32xf32> -> vector<128x32xf32>
    %10 = arith.addf %6, %9 : vector<128x32xf32>
    %c0_13 = arith.constant 0 : index
    %c0_14 = arith.constant 0 : index
    %11 = vector.load %arg7[%c0_13, %c0_14] : memref<1x32xf32, #tpu.memory_space<vmem>>, vector<1x32xf32>
    %12 = vector.broadcast %11 : vector<1x32xf32> to vector<128x32xf32>
    %13 = arith.addf %10, %12 : vector<128x32xf32>
    %cst_15 = arith.constant 0.000000e+00 : f32
    %14 = vector.broadcast %cst_15 : f32 to vector<128x32xf32>
    %15 = arith.maximumf %13, %14 : vector<128x32xf32>
    %cst_16 = arith.constant dense<0.000000e+00> : vector<128xf32>
    %16 = vector.multi_reduction <add>, %15, %cst_16 [1] : vector<128x32xf32> to vector<128xf32>
    %17 = vector.shape_cast %16 : vector<128xf32> to vector<128x1xf32>
    %cst_17 = arith.constant 3.200000e+01 : f32
    %18 = vector.broadcast %cst_17 : f32 to vector<128x1xf32>
    %19 = arith.divf %17, %18 : vector<128x1xf32>
    %20 = vector.broadcast %19 : vector<128x1xf32> to vector<128x32xf32>
    %21 = arith.subf %15, %20 : vector<128x32xf32>
    %22 = arith.mulf %21, %21 : vector<128x32xf32>
    %cst_18 = arith.constant dense<0.000000e+00> : vector<128xf32>
    %23 = vector.multi_reduction <add>, %22, %cst_18 [1] : vector<128x32xf32> to vector<128xf32>
    %24 = vector.shape_cast %23 : vector<128xf32> to vector<128x1xf32>
    %cst_19 = arith.constant 3.200000e+01 : f32
    %25 = vector.broadcast %cst_19 : f32 to vector<128x1xf32>
    %26 = arith.divf %24, %25 : vector<128x1xf32>
    %27 = vector.broadcast %19 : vector<128x1xf32> to vector<128x32xf32>
    %28 = arith.subf %15, %27 : vector<128x32xf32>
    %cst_20 = arith.constant 9.99999974E-6 : f32
    %29 = vector.broadcast %cst_20 : f32 to vector<128x1xf32>
    %30 = arith.addf %26, %29 : vector<128x1xf32>
    %31 = math.rsqrt %30 : vector<128x1xf32>
    %32 = vector.broadcast %31 : vector<128x1xf32> to vector<128x32xf32>
    %33 = arith.mulf %28, %32 : vector<128x32xf32>
    %c0_21 = arith.constant 0 : index
    %c0_22 = arith.constant 0 : index
    %34 = vector.load %arg12[%c0_21, %c0_22] : memref<1x32xf32, #tpu.memory_space<vmem>>, vector<1x32xf32>
    %35 = vector.broadcast %34 : vector<1x32xf32> to vector<128x32xf32>
    %36 = arith.mulf %33, %35 : vector<128x32xf32>
    %c0_23 = arith.constant 0 : index
    %c0_24 = arith.constant 0 : index
    %37 = vector.load %arg13[%c0_23, %c0_24] : memref<1x32xf32, #tpu.memory_space<vmem>>, vector<1x32xf32>
    %38 = vector.broadcast %37 : vector<1x32xf32> to vector<128x32xf32>
    %39 = arith.addf %36, %38 : vector<128x32xf32>
    %c0_25 = arith.constant 0 : index
    %c0_26 = arith.constant 0 : index
    %40 = vector.load %arg8[%c0_25, %c0_26] : memref<32x32xf32, #tpu.memory_space<vmem>>, vector<32x32xf32>
    %cst_27 = arith.constant dense<0.000000e+00> : vector<128x32xf32>
    %41 = tpu.matmul %39, %40, %cst_27 {dimension_numbers = #tpu.dot_dimension_numbers<[1], [0], [0], [1], [0, 0, 1, 1], [], []>} : vector<128x32xf32>, vector<32x32xf32>, vector<128x32xf32> -> vector<128x32xf32>
    %c0_28 = arith.constant 0 : index
    %c0_29 = arith.constant 0 : index
    %42 = vector.load %arg9[%c0_28, %c0_29] : memref<1x32xf32, #tpu.memory_space<vmem>>, vector<1x32xf32>
    %43 = vector.broadcast %42 : vector<1x32xf32> to vector<128x32xf32>
    %44 = arith.addf %41, %43 : vector<128x32xf32>
    %cst_30 = arith.constant 0.000000e+00 : f32
    %45 = vector.broadcast %cst_30 : f32 to vector<128x32xf32>
    %46 = arith.maximumf %44, %45 : vector<128x32xf32>
    %cst_31 = arith.constant dense<0.000000e+00> : vector<128xf32>
    %47 = vector.multi_reduction <add>, %46, %cst_31 [1] : vector<128x32xf32> to vector<128xf32>
    %48 = vector.shape_cast %47 : vector<128xf32> to vector<128x1xf32>
    %cst_32 = arith.constant 3.200000e+01 : f32
    %49 = vector.broadcast %cst_32 : f32 to vector<128x1xf32>
    %50 = arith.divf %48, %49 : vector<128x1xf32>
    %51 = vector.broadcast %50 : vector<128x1xf32> to vector<128x32xf32>
    %52 = arith.subf %46, %51 : vector<128x32xf32>
    %53 = arith.mulf %52, %52 : vector<128x32xf32>
    %cst_33 = arith.constant dense<0.000000e+00> : vector<128xf32>
    %54 = vector.multi_reduction <add>, %53, %cst_33 [1] : vector<128x32xf32> to vector<128xf32>
    %55 = vector.shape_cast %54 : vector<128xf32> to vector<128x1xf32>
    %cst_34 = arith.constant 3.200000e+01 : f32
    %56 = vector.broadcast %cst_34 : f32 to vector<128x1xf32>
    %57 = arith.divf %55, %56 : vector<128x1xf32>
    %58 = vector.broadcast %50 : vector<128x1xf32> to vector<128x32xf32>
    %59 = arith.subf %46, %58 : vector<128x32xf32>
    %cst_35 = arith.constant 9.99999974E-6 : f32
    %60 = vector.broadcast %cst_35 : f32 to vector<128x1xf32>
    %61 = arith.addf %57, %60 : vector<128x1xf32>
    %62 = math.rsqrt %61 : vector<128x1xf32>
    %63 = vector.broadcast %62 : vector<128x1xf32> to vector<128x32xf32>
    %64 = arith.mulf %59, %63 : vector<128x32xf32>
    %c0_36 = arith.constant 0 : index
    %c0_37 = arith.constant 0 : index
    %65 = vector.load %arg14[%c0_36, %c0_37] : memref<1x32xf32, #tpu.memory_space<vmem>>, vector<1x32xf32>
    %66 = vector.broadcast %65 : vector<1x32xf32> to vector<128x32xf32>
    %67 = arith.mulf %64, %66 : vector<128x32xf32>
    %c0_38 = arith.constant 0 : index
    %c0_39 = arith.constant 0 : index
    %68 = vector.load %arg15[%c0_38, %c0_39] : memref<1x32xf32, #tpu.memory_space<vmem>>, vector<1x32xf32>
    %69 = vector.broadcast %68 : vector<1x32xf32> to vector<128x32xf32>
    %70 = arith.addf %67, %69 : vector<128x32xf32>
    %c0_40 = arith.constant 0 : index
    %c0_41 = arith.constant 0 : index
    %71 = vector.load %arg10[%c0_40, %c0_41] : memref<1x32xf32, #tpu.memory_space<vmem>>, vector<1x32xf32>
    %cst_42 = arith.constant dense<0.000000e+00> : vector<1x128xf32>
    %72 = tpu.matmul %71, %70, %cst_42 {dimension_numbers = #tpu.dot_dimension_numbers<[1], [1], [0], [0], [0, 0, 1, 0], [], []>} : vector<1x32xf32>, vector<128x32xf32>, vector<1x128xf32> -> vector<1x128xf32>
    %c0_43 = arith.constant 0 : index
    %c0_44 = arith.constant 0 : index
    %73 = vector.load %arg11[%c0_43, %c0_44] : memref<1x1xf32, #tpu.memory_space<vmem>>, vector<1x1xf32>
    %74 = vector.broadcast %73 : vector<1x1xf32> to vector<1x128xf32>
    %75 = arith.addf %72, %74 : vector<1x128xf32>
    %c0_45 = arith.constant 0 : index
    %c0_46 = arith.constant 0 : index
    %c0_47 = arith.constant 0 : index
    %76 = vector.load %arg16[%c0_45, %c0_46, %c0_47] : memref<1x1x128xf32, #tpu.memory_space<vmem>>, vector<1x1x128xf32>
    %77 = vector.shape_cast %76 : vector<1x1x128xf32> to vector<1x128xf32>
    %78 = vector.shape_cast %75 : vector<1x128xf32> to vector<1x1x128xf32>
    tpu.vector_store %arg16[%c0_45, %c0_46, %c0_47], %78 {strides = array<i32>} : memref<1x1x128xf32, #tpu.memory_space<vmem>>, vector<1x1x128xf32>,
    return
  }
  func.func @transform_0(%arg0: i32) -> (i32, i32) {
    %c0_i32 = arith.constant 0 : i32
    %c0_i32_0 = arith.constant 0 : i32
    return %arg0, %c0_i32 : i32, i32
  }
  func.func @transform_1(%arg0: i32) -> (i32, i32) {
    %c0_i32 = arith.constant 0 : i32
    %c0_i32_0 = arith.constant 0 : i32
    return %arg0, %c0_i32 : i32, i32
  }
  func.func @transform_2(%arg0: i32) -> (i32, i32) {
    %c0_i32 = arith.constant 0 : i32
    %c0_i32_0 = arith.constant 0 : i32
    return %arg0, %c0_i32 : i32, i32
  }
  func.func @transform_3(%arg0: i32) -> (i32, i32) {
    %c0_i32 = arith.constant 0 : i32
    %c0_i32_0 = arith.constant 0 : i32
    %c0_i32_1 = arith.constant 0 : i32
    return %c0_i32, %c0_i32_0 : i32, i32
  }
  func.func @transform_4(%arg0: i32) -> (i32, i32) {
    %c0_i32 = arith.constant 0 : i32
    %c0_i32_0 = arith.constant 0 : i32
    %c0_i32_1 = arith.constant 0 : i32
    return %c0_i32, %c0_i32_0 : i32, i32
  }
  func.func @transform_5(%arg0: i32) -> (i32, i32) {
    %c0_i32 = arith.constant 0 : i32
    %c0_i32_0 = arith.constant 0 : i32
    %c0_i32_1 = arith.constant 0 : i32
    return %c0_i32, %c0_i32_0 : i32, i32
  }
  func.func @transform_6(%arg0: i32) -> (i32, i32) {
    %c0_i32 = arith.constant 0 : i32
    %c0_i32_0 = arith.constant 0 : i32
    %c0_i32_1 = arith.constant 0 : i32
    return %c0_i32, %c0_i32_0 : i32, i32
  }
  func.func @transform_7(%arg0: i32) -> (i32, i32) {
    %c0_i32 = arith.constant 0 : i32
    %c0_i32_0 = arith.constant 0 : i32
    %c0_i32_1 = arith.constant 0 : i32
    return %c0_i32, %c0_i32_0 : i32, i32
  }
  func.func @transform_8(%arg0: i32) -> (i32, i32) {
    %c0_i32 = arith.constant 0 : i32
    %c0_i32_0 = arith.constant 0 : i32
    %c0_i32_1 = arith.constant 0 : i32
    return %c0_i32, %c0_i32_0 : i32, i32
  }
  func.func @transform_9(%arg0: i32) -> (i32, i32) {
    %c0_i32 = arith.constant 0 : i32
    %c0_i32_0 = arith.constant 0 : i32
    %c0_i32_1 = arith.constant 0 : i32
    return %c0_i32, %c0_i32_0 : i32, i32
  }
  func.func @transform_10(%arg0: i32) -> (i32, i32) {
    %c0_i32 = arith.constant 0 : i32
    %c0_i32_0 = arith.constant 0 : i32
    %c0_i32_1 = arith.constant 0 : i32
    return %c0_i32, %c0_i32_0 : i32, i32
  }
  func.func @transform_11(%arg0: i32) -> (i32, i32) {
    %c0_i32 = arith.constant 0 : i32
    %c0_i32_0 = arith.constant 0 : i32
    %c0_i32_1 = arith.constant 0 : i32
    return %c0_i32, %c0_i32_0 : i32, i32
  }
  func.func @transform_12(%arg0: i32) -> (i32, i32) {
    %c0_i32 = arith.constant 0 : i32
    %c0_i32_0 = arith.constant 0 : i32
    %c0_i32_1 = arith.constant 0 : i32
    return %c0_i32, %c0_i32_0 : i32, i32
  }
  func.func @transform_13(%arg0: i32) -> (i32, i32) {
    %c0_i32 = arith.constant 0 : i32
    %c0_i32_0 = arith.constant 0 : i32
    %c0_i32_1 = arith.constant 0 : i32
    return %c0_i32, %c0_i32_0 : i32, i32
  }
  func.func @transform_14(%arg0: i32) -> (i32, i32) {
    %c0_i32 = arith.constant 0 : i32
    %c0_i32_0 = arith.constant 0 : i32
    %c0_i32_1 = arith.constant 0 : i32
    return %c0_i32, %c0_i32_0 : i32, i32
  }
  func.func @transform_15(%arg0: i32) -> (i32, i32, i32) {
    %c0_i32 = arith.constant 0 : i32
    %c0_i32_0 = arith.constant 0 : i32
    %c0_i32_1 = arith.constant 0 : i32
    return %arg0, %c0_i32, %c0_i32_0 : i32, i32, i32
  }
}

</mosaic_0001>

<bundles_post_ra>
// kernel: tpu_custom_call.1
= control target key start
LH: loop header
LB: loop body
LE: loop exit
PB: predicated region body
PF: predicated region fallthrough
CT: control target
= control target key end

     0   :  { %s2807_s0 = inlined_call_operand.vmem [shape: f32[128,8], index: 0, kind: input, shape index: {}]   ;;  %s2808_s1 = inlined_call_operand.vmem [shape: f32[128,8], index: 1, kind: input, shape index: {}]   ;;  %s2809_s2 = inlined_call_operand.vmem [shape: f32[128,4], index: 2, kind: input, shape index: {}]   ;;  %s2810_s3 = inlined_call_operand.vmem [shape: f32[8,32], index: 3, kind: input, shape index: {}]   ;;  %s2811_s4 = inlined_call_operand.vmem [shape: f32[8,32], index: 4, kind: input, shape index: {}]   ;;  %s2812_s5 = inlined_call_operand.vmem [shape: f32[4,32], index: 5, kind: input, shape index: {}]   ;;  %s2813_s6 = inlined_call_operand.vmem [shape: f32[1,32], index: 6, kind: input, shape index: {}]   ;;  %s2814_s7 = inlined_call_operand.vmem [shape: f32[32,32], index: 7, kind: input, shape index: {}]   ;;  %s2815_s8 = inlined_call_operand.vmem [shape: f32[1,32], index: 8, kind: input, shape index: {}]   ;;  %s2816_s9 = inlined_call_operand.vmem [shape: f32[1,32], index: 9, kind: input, shape index: {}]   ;;  %s2817_s10 = inlined_call_operand.<no memory space> [shape: f32[1,1], index: 10, kind: input, shape index: {}]   ;;  %s2818_s11 = inlined_call_operand.vmem [shape: f32[1,32], index: 11, kind: input, shape index: {}]   ;;  %s2819_s12 = inlined_call_operand.vmem [shape: f32[1,32], index: 12, kind: input, shape index: {}]   ;;  %s2820_s13 = inlined_call_operand.vmem [shape: f32[1,32], index: 13, kind: input, shape index: {}]   ;;  %s2821_s14 = inlined_call_operand.vmem [shape: f32[1,32], index: 14, kind: input, shape index: {}]   ;;  %s2822_s15 = inlined_call_operand.hbm [shape: f32[1,1,128], index: 15, kind: output, shape index: {}]  }
   0x1   :  { %v20_v0 = vstv %s2817_s10 }
   0x2   :  { %21 = vst [vmem:[#allocation2] sm:$0x1] %v20_v0 }
   0x3   :  { %v330_v1 = vld [vmem:[%s2812_s5] sm:$0xf]  ;;  %vm380_vm0 = vcmask 1043456   ;;  %vm331_vm1 = vcmask 31744   ;;  %vm87_vm2 = vcmask 64512   ;;  %v315_v7 = vld [vmem:[%s2809_s2 + $0x8] sm:$0xff] }
   0x4   :  { %v314_v2 = vld [vmem:[%s2809_s2] sm:$0xff]  ;;  %1558 = vmatpush.msk.msra.mxu2 %vm380_vm0, %v330_v1  ;;  %v71_v8 = vld [vmem:[%s2808_s1 + $0x8] sm:$0xff] }
   0x5   :  { %v86_v3 = vld [vmem:[%s2811_s4] sm:$0xff]  ;;  %1559 = vmatmul.msk.f32.vlgmr.msra.gmra.mxu2 %vm331_vm1, %v314_v2  ;;  %v54_v9 = vld [vmem:[%s2807_s0 + $0x8] sm:$0xff] }
   0x6   :  { %151 = vmatpush.msra.mxu0 %v86_v3  ;;  %v69_v4 = vld [vmem:[%s2810_s3] sm:$0xff] }
   0x7   :  { %v70_v5 = vld [vmem:[%s2808_s1] sm:$0xff]  ;;  %264 = vmatpush.msra.mxu1 %v69_v4 }
   0x8   :  { %v53_v6 = vld [vmem:[%s2807_s0] sm:$0xff]  ;;  %1526 = vmatmul.msk.f32.vlgmr.msra.gmra.mxu0 %vm87_vm2, %v70_v5 }
   0x9   :  { %1542 = vmatmul.msk.f32.vlgmr.msra.gmra.mxu1 %vm87_vm2, %v53_v6 }
   0xa   :  { %22 = vsyncpa [#allocation4], 0  ;;  %v316_v10 = vld [vmem:[%s2809_s2 + $0x10] sm:$0xff]  ;;  %v317_v13 = vld [vmem:[%s2809_s2 + $0x18] sm:$0xff]  ;;  %vm501_vm3 = vcmask 261120   ;;  %s1713_s19 = smov [#allocation3]  }
   0xb   :  { %v72_v11 = vld [vmem:[%s2808_s1 + $0x10] sm:$0xff]  ;;  %v73_v14 = vld [vmem:[%s2808_s1 + $0x18] sm:$0xff]  ;;  %v318_v16 = vld [vmem:[%s2809_s2 + $0x20] sm:$0xff]  ;;  %s1515_s20 = sshll.u32 %s1713_s19, 4  ;;  %s1517_s23 = sshll.u32 %s2822_s15, 4  ;;  %s1516_s20 = int_to_ptr.vmem [resolvable:$true] %s1515_s20  ;;  %s1518_s23 = int_to_ptr.hbm [resolvable:$true] %s1517_s23 }
   0xc   :  { %v55_v12 = vld [vmem:[%s2807_s0 + $0x10] sm:$0xff]  ;;  %v56_v15 = vld [vmem:[%s2807_s0 + $0x18] sm:$0xff]  ;;  %v74_v17 = vld [vmem:[%s2808_s1 + $0x20] sm:$0xff] }
   0xd   :  { %1560 = vmatmul.msk.f32.gmra.mxu2 %vm331_vm1, %v315_v7  ;;  %v57_v18 = vld [vmem:[%s2807_s0 + $0x20] sm:$0xff]  ;;  %v319_v19 = vld [vmem:[%s2809_s2 + $0x28] sm:$0xff]  ;;  %v320_v22 = vld [vmem:[%s2809_s2 + $0x30] sm:$0xff] }
   0xe   :  { %v75_v20 = vld [vmem:[%s2808_s1 + $0x28] sm:$0xff]  ;;  %v76_v23 = vld [vmem:[%s2808_s1 + $0x30] sm:$0xff]  ;;  %v321_v25 = vld [vmem:[%s2809_s2 + $0x38] sm:$0xff] }
   0xf   :  { %v58_v21 = vld [vmem:[%s2807_s0 + $0x28] sm:$0xff]  ;;  %v59_v24 = vld [vmem:[%s2807_s0 + $0x30] sm:$0xff]  ;;  %v77_v26 = vld [vmem:[%s2808_s1 + $0x38] sm:$0xff] }
  0x10   :  { %1527 = vmatmul.msk.f32.gmra.mxu0 %vm87_vm2, %v71_v8  ;;  %v60_v27 = vld [vmem:[%s2807_s0 + $0x38] sm:$0xff]  ;;  %v322_v28 = vld [vmem:[%s2809_s2 + $0x40] sm:$0xff]  ;;  %v323_v31 = vld [vmem:[%s2809_s2 + $0x48] sm:$0xff] }
  0x11   :  { %1543 = vmatmul.msk.f32.gmra.mxu1 %vm87_vm2, %v54_v9  ;;  %v78_v29 = vld [vmem:[%s2808_s1 + $0x40] sm:$0xff]  ;;  %v79_v32 = vld [vmem:[%s2808_s1 + $0x48] sm:$0xff]  ;;  %v324_v34 = vld [vmem:[%s2809_s2 + $0x50] sm:$0xff] }
  0x12   :  { %v61_v30 = vld [vmem:[%s2807_s0 + $0x40] sm:$0xff]  ;;  %v62_v33 = vld [vmem:[%s2807_s0 + $0x48] sm:$0xff]  ;;  %v80_v37 = vld [vmem:[%s2808_s1 + $0x50] sm:$0xff] }
  0x13   :  { %v63_v38 = vld [vmem:[%s2807_s0 + $0x50] sm:$0xff]  ;;  %v1941_v40 = vld [vmem:[%s2813_s6] ss:$0 sm:$0xff]  ;;  %v325_v41 = vld [vmem:[%s2809_s2 + $0x58] sm:$0xff] }
  0x14   :  { %v81_v44 = vld [vmem:[%s2808_s1 + $0x58] sm:$0xff]  ;;  %v326_v52 = vld [vmem:[%s2809_s2 + $0x60] sm:$0xff]  ;;  %v327_v63 = vld [vmem:[%s2809_s2 + $0x68] sm:$0xff] }
  0x15   :  { %1561 = vmatmul.msk.f32.gmra.mxu2 %vm331_vm1, %v316_v10  ;;  %v64_v45 = vld [vmem:[%s2807_s0 + $0x58] sm:$0xff]  ;;  %v82_v58 = vld [vmem:[%s2808_s1 + $0x60] sm:$0xff]  ;;  %v83_v5 = vld [vmem:[%s2808_s1 + $0x68] sm:$0xff] }
  0x16   :  { %v65_v59 = vld [vmem:[%s2807_s0 + $0x60] sm:$0xff]  ;;  %v66_v6 = vld [vmem:[%s2807_s0 + $0x68] sm:$0xff] }
  0x18   :  { %1528 = vmatmul.msk.f32.gmra.mxu0 %vm87_vm2, %v72_v11 }
  0x19   :  { %1544 = vmatmul.msk.f32.gmra.mxu1 %vm87_vm2, %v55_v12 }
  0x1d   :  { %1562 = vmatmul.msk.f32.gmra.mxu2 %vm331_vm1, %v317_v13 }
  0x20   :  { %1529 = vmatmul.msk.f32.gmra.mxu0 %vm87_vm2, %v73_v14 }
  0x21   :  { %1545 = vmatmul.msk.f32.gmra.mxu1 %vm87_vm2, %v56_v15 }
  0x25   :  { %1563 = vmatmul.msk.f32.gmra.mxu2 %vm331_vm1, %v318_v16 }
  0x28   :  { %1530 = vmatmul.msk.f32.gmra.mxu0 %vm87_vm2, %v74_v17 }
  0x29   :  { %1546 = vmatmul.msk.f32.gmra.mxu1 %vm87_vm2, %v57_v18 }
  0x2d   :  { %1564 = vmatmul.msk.f32.gmra.mxu2 %vm331_vm1, %v319_v19 }
  0x30   :  { %1531 = vmatmul.msk.f32.gmra.mxu0 %vm87_vm2, %v75_v20 }
  0x31   :  { %1547 = vmatmul.msk.f32.gmra.mxu1 %vm87_vm2, %v58_v21 }
  0x35   :  { %1565 = vmatmul.msk.f32.gmra.mxu2 %vm331_vm1, %v320_v22 }
  0x38   :  { %1532 = vmatmul.msk.f32.gmra.mxu0 %vm87_vm2, %v76_v23 }
  0x39   :  { %1548 = vmatmul.msk.f32.gmra.mxu1 %vm87_vm2, %v59_v24 }
  0x3d   :  { %1566 = vmatmul.msk.f32.gmra.mxu2 %vm331_vm1, %v321_v25 }
  0x40   :  { %1533 = vmatmul.msk.f32.gmra.mxu0 %vm87_vm2, %v77_v26 }
  0x41   :  { %1549 = vmatmul.msk.f32.gmra.mxu1 %vm87_vm2, %v60_v27 }
  0x45   :  { %1567 = vmatmul.msk.f32.gmra.mxu2 %vm331_vm1, %v322_v28 }
  0x48   :  { %1534 = vmatmul.msk.f32.gmra.mxu0 %vm87_vm2, %v78_v29 }
  0x49   :  { %1550 = vmatmul.msk.f32.gmra.mxu1 %vm87_vm2, %v61_v30 }
  0x4d   :  { %1568 = vmatmul.msk.f32.gmra.mxu2 %vm331_vm1, %v323_v31 }
  0x50   :  { %1535 = vmatmul.msk.f32.gmra.mxu0 %vm87_vm2, %v79_v32 }
  0x51   :  { %1551 = vmatmul.msk.f32.gmra.mxu1 %vm87_vm2, %v62_v33 }
  0x55   :  { %1569 = vmatmul.msk.f32.gmra.mxu2 %vm331_vm1, %v324_v34 }
  0x58   :  { %1536 = vmatmul.msk.f32.gmra.mxu0 %vm87_vm2, %v80_v37 }
  0x59   :  { %1552 = vmatmul.msk.f32.gmra.mxu1 %vm87_vm2, %v63_v38 }
  0x5d   :  { %1570 = vmatmul.msk.f32.gmra.mxu2 %vm331_vm1, %v325_v41  ;;  %v1711_v41 = vmov 32.0  }
  0x5e   :  { %1619 = vrcp.f32 %v1711_v41 }
  0x60   :  { %1537 = vmatmul.msk.f32.gmra.mxu0 %vm87_vm2, %v81_v44  ;;  %v67_v44 = vld [vmem:[%s2807_s0 + $0x70] sm:$0xff] }
  0x61   :  { %1553 = vmatmul.msk.f32.gmra.mxu1 %vm87_vm2, %v64_v45  ;;  %v329_v45 = vld [vmem:[%s2809_s2 + $0x78] sm:$0xff] }
  0x65   :  { %1571 = vmatmul.msk.f32.gmra.mxu2 %vm331_vm1, %v326_v52 }
  0x68   :  { %1538 = vmatmul.msk.f32.gmra.mxu0 %vm87_vm2, %v82_v58 }
  0x69   :  { %1554 = vmatmul.msk.f32.gmra.mxu1 %vm87_vm2, %v65_v59 }
  0x6d   :  { %1572 = vmatmul.msk.f32.gmra.mxu2 %vm331_vm1, %v327_v63 }
  0x70   :  { %1539 = vmatmul.msk.f32.gmra.mxu0 %vm87_vm2, %v83_v5 }
  0x71   :  { %1555 = vmatmul.msk.f32.gmra.mxu1 %vm87_vm2, %v66_v6 }
  0x79   :  { %1556 = vmatmul.msk.f32.gmra.mxu1 %vm87_vm2, %v67_v44 }
  0x85   :  { %v153_v35 = vpop.f32.mrf.mxu0 }
  0x86   :  { %v266_v36 = vpop.f32.mrf.mxu1 }
  0x87   :  { %v267_v39 = vadd.f32 %v266_v36, %v153_v35 }
  0x88   :  { %v401_v42 = vpop.f32.mrf.mxu2 }
  0x89   :  { %v449_v43 = vadd.f32 %v401_v42, %v267_v39  ;;  %v328_v39 = vld [vmem:[%s2809_s2 + $0x70] sm:$0xff]  ;;  %v1620_v42 = vpop.eup %1619 }
  0x8a   :  { %1573 = vmatmul.msk.f32.gmra.mxu2 %vm331_vm1, %v328_v39  ;;  %vm555_vm4 = vweird.f32 %v1620_v42 }
  0x8b   :  { %v1954_v48 = vadd.f32 %v1941_v40, %v449_v43  ;;  %v84_v43 = vld [vmem:[%s2808_s1 + $0x70] sm:$0xff] }
  0x8c   :  { %1540 = vmatmul.msk.f32.gmra.mxu0 %vm87_vm2, %v84_v43 }
  0x8d   :  { %v156_v46 = vpop.f32.mrf.mxu0  ;;  %v485_v50 = vmax.f32 %v1954_v48, 0.0 }
  0x8e   :  { %v269_v47 = vpop.f32.mrf.mxu1 }
  0x8f   :  { %v270_v49 = vadd.f32 %v269_v47, %v156_v46  ;;  %v502_v51 = vsel %vm501_vm3, %v485_v50, 0.0  ;;  %v551_v47 = vmul.f32 32.0, %v1620_v42 }
  0x90   :  { %v404_v53 = vpop.f32.mrf.mxu2  ;;  %503 = vadd.xlane.f32.xlu0 %v502_v51 }
  0x91   :  { %v450_v54 = vadd.f32 %v404_v53, %v270_v49  ;;  %v552_v51 = vsub.f32 1.0, %v551_v47  ;;  %v85_v53 = vld [vmem:[%s2808_s1 + $0x78] sm:$0xff] }
  0x92   :  { %1574 = vmatmul.msk.f32.gmra.mxu2 %vm331_vm1, %v329_v45 }
  0x93   :  { %v1967_v55 = vadd.f32 %v1941_v40, %v450_v54  ;;  %v68_v54 = vld [vmem:[%s2807_s0 + $0x78] sm:$0xff] }
  0x94   :  { %1541 = vmatmul.msk.f32.gmra.mxu0 %vm87_vm2, %v85_v53  ;;  %1557 = vmatmul.msk.f32.gmra.mxu1 %vm87_vm2, %v68_v54 }
  0x95   :  { %v159_v56 = vpop.f32.mrf.mxu0  ;;  %v486_v61 = vmax.f32 %v1967_v55, 0.0 }
  0x96   :  { %v272_v57 = vpop.f32.mrf.mxu1 }
  0x97   :  { %v273_v60 = vadd.f32 %v272_v57, %v159_v56  ;;  %v505_v62 = vsel %vm501_vm3, %v486_v61, 0.0  ;;  %v553_v56 = vmul.f32 %v1620_v42, %v552_v51 }
  0x98   :  { %v407_v0 = vpop.f32.mrf.mxu2  ;;  %506 = vadd.xlane.f32.xlu0 %v505_v62 }
  0x99   :  { %v451_v1 = vadd.f32 %v407_v0, %v273_v60  ;;  %v554_v59 = vadd.f32 %v1620_v42, %v553_v56 }
  0x9b   :  { %v1986_v4 = vadd.f32 %v1941_v40, %v451_v1  ;;  %v2052_v63 = vsel %vm555_vm4, %v1620_v42, %v554_v59 }
  0x9d   :  { %v162_v2 = vpop.f32.mrf.mxu0  ;;  %v487_v8 = vmax.f32 %v1986_v4, 0.0 }
  0x9e   :  { %v275_v3 = vpop.f32.mrf.mxu1 }
  0x9f   :  { %v276_v7 = vadd.f32 %v275_v3, %v162_v2  ;;  %v508_v9 = vsel %vm501_vm3, %v487_v8, 0.0 }
  0xa0   :  { %v410_v10 = vpop.f32.mrf.mxu2  ;;  %509 = vadd.xlane.f32.xlu1 %v508_v9 }
  0xa1   :  { %v452_v11 = vadd.f32 %v410_v10, %v276_v7 }
  0xa3   :  { %v2001_v12 = vadd.f32 %v1941_v40, %v452_v11 }
  0xa5   :  { %v165_v13 = vpop.f32.mrf.mxu0  ;;  %v488_v16 = vmax.f32 %v2001_v12, 0.0 }
  0xa6   :  { %v278_v14 = vpop.f32.mrf.mxu1 }
  0xa7   :  { %v279_v15 = vadd.f32 %v278_v14, %v165_v13  ;;  %v511_v17 = vsel %vm501_vm3, %v488_v16, 0.0 }
  0xa8   :  { %v413_v18 = vpop.f32.mrf.mxu2  ;;  %512 = vadd.xlane.f32.xlu1 %v511_v17 }
  0xa9   :  { %v453_v19 = vadd.f32 %v413_v18, %v279_v15 }
  0xab   :  { %v2008_v22 = vadd.f32 %v1941_v40, %v453_v19 }
  0xad   :  { %v168_v20 = vpop.f32.mrf.mxu0  ;;  %v489_v24 = vmax.f32 %v2008_v22, 0.0 }
  0xae   :  { %v281_v21 = vpop.f32.mrf.mxu1 }
  0xaf   :  { %v282_v23 = vadd.f32 %v281_v21, %v168_v20  ;;  %v514_v25 = vsel %vm501_vm3, %v489_v24, 0.0 }
  0xb0   :  { %v416_v26 = vpop.f32.mrf.mxu2  ;;  %515 = vadd.xlane.f32.xlu2 %v514_v25 }
  0xb1   :  { %v454_v27 = vadd.f32 %v416_v26, %v282_v23 }
  0xb3   :  { %v2015_v28 = vadd.f32 %v1941_v40, %v454_v27 }
  0xb5   :  { %v171_v29 = vpop.f32.mrf.mxu0  ;;  %v490_v32 = vmax.f32 %v2015_v28, 0.0 }
  0xb6   :  { %v284_v30 = vpop.f32.mrf.mxu1 }
  0xb7   :  { %v285_v31 = vadd.f32 %v284_v30, %v171_v29  ;;  %v517_v33 = vsel %vm501_vm3, %v490_v32, 0.0 }
  0xb8   :  { %v419_v34 = vpop.f32.mrf.mxu2  ;;  %518 = vadd.xlane.f32.xlu2 %v517_v33 }
  0xb9   :  { %v455_v35 = vadd.f32 %v419_v34, %v285_v31 }
  0xbb   :  { %v2022_v36 = vadd.f32 %v1941_v40, %v455_v35 }
  0xbd   :  { %v491_v37 = vmax.f32 %v2022_v36, 0.0  ;;  %v174_v46 = vpop.f32.mrf.mxu0 }
  0xbe   :  { %v287_v49 = vpop.f32.mrf.mxu1 }
  0xbf   :  { %v520_v38 = vsel %vm501_vm3, %v491_v37, 0.0  ;;  %v288_v62 = vadd.f32 %v287_v49, %v174_v46 }
  0xc0   :  { %521 = vadd.xlane.f32.xlu1 %v520_v38  ;;  %v422_v52 = vpop.f32.mrf.mxu2 }
  0xc1   :  { %v456_v2 = vadd.f32 %v422_v52, %v288_v62 }
  0xc3   :  { %v2060_v7 = vadd.f32 %v1941_v40, %v456_v2 }
  0xc5   :  { %v177_v57 = vpop.f32.mrf.mxu0  ;;  %v492_v18 = vmax.f32 %v2060_v7, 0.0 }
  0xc6   :  { %v290_v58 = vpop.f32.mrf.mxu1 }
  0xc7   :  { %v291_v10 = vadd.f32 %v290_v58, %v177_v57  ;;  %v523_v21 = vsel %vm501_vm3, %v492_v18, 0.0 }
  0xc8   :  { %v425_v60 = vpop.f32.mrf.mxu2 }
  0xc9   :  { %v457_v17 = vadd.f32 %v425_v60, %v291_v10 }
  0xcb   :  { %v2072_v20 = vadd.f32 %v1941_v40, %v457_v17 }
  0xcd   :  { %v180_v3 = vpop.f32.mrf.mxu0  ;;  %v493_v30 = vmax.f32 %v2072_v20, 0.0  ;;  %v2202_v20 = vld [vmem:[%s2818_s11] ss:$0 sm:$0xff] }
  0xce   :  { %v293_v5 = vpop.f32.mrf.mxu1 }
  0xcf   :  { %v294_v25 = vadd.f32 %v293_v5, %v180_v3  ;;  %v526_v35 = vsel %vm501_vm3, %v493_v30, 0.0 }
  0xd0   :  { %v428_v11 = vpop.f32.mrf.mxu2 }
  0xd1   :  { %v458_v29 = vadd.f32 %v428_v11, %v294_v25 }
  0xd3   :  { %v2087_v33 = vadd.f32 %v1941_v40, %v458_v29 }
  0xd5   :  { %v494_v44 = vmax.f32 %v2087_v33, 0.0 }
  0xd6   :  { %v296_v19 = vpop.f32.mrf.mxu1 }
  0xd7   :  { %v529_v49 = vsel %vm501_vm3, %v494_v44, 0.0 }
  0xd8   :  { %v431_v55 = vpop.f32.mrf.mxu2 }
  0xde   :  { %v299_v41 = vpop.f32.mrf.mxu1 }
  0xe0   :  { %v434_v45 = vpop.f32.mrf.mxu2 }
  0xe6   :  { %v302_v12 = vpop.f32.mrf.mxu1 }
  0xe8   :  { %v437_v60 = vpop.f32.mrf.mxu2 }
  0xee   :  { %v305_v11 = vpop.f32.mrf.mxu1 }
 0x103   :  { %v504_v0 = vpop.xlane.xlu0 %503 }
 0x104   :  { %v557_v1 = vmul.f32 %v2052_v63, %v504_v0 }
 0x106   :  { %v2057_v6 = vsub.f32 %v485_v50, %v557_v1  ;;  %v183_v50 = vpop.f32.mrf.mxu0 }
 0x107   :  { %v297_v38 = vadd.f32 %v296_v19, %v183_v50  ;;  %v440_v19 = vpop.f32.mrf.mxu2 }
 0x108   :  { %v589_v9 = vmul.f32 %v2057_v6, %v2057_v6 }
 0x10a   :  { %v605_v13 = vsel %vm501_vm3, %v589_v9, 0.0 }
 0x10b   :  { %606 = vadd.xlane.f32.xlu0 %v605_v13  ;;  %v507_v14 = vpop.xlane.xlu0 %506 }
 0x10c   :  { %v558_v15 = vmul.f32 %v2052_v63, %v507_v14 }
 0x10e   :  { %v2069_v48 = vsub.f32 %v486_v61, %v558_v15  ;;  %v186_v39 = vpop.f32.mrf.mxu0 }
 0x10f   :  { %v300_v52 = vadd.f32 %v299_v41, %v186_v39  ;;  %v901_v39 = vld [vmem:[%s2814_s7] sm:$0xff] }
 0x110   :  { %v590_v23 = vmul.f32 %v2069_v48, %v2069_v48 }
 0x111   :  { %v460_v57 = vadd.f32 %v434_v45, %v300_v52  ;;  %v443_v45 = vpop.f32.mrf.mxu2 }
 0x112   :  { %v608_v26 = vsel %vm501_vm3, %v590_v23, 0.0 }
 0x113   :  { %v510_v27 = vpop.xlane.xlu1 %509  ;;  %524 = vadd.xlane.f32.xlu0 %v523_v21  ;;  %609 = vadd.xlane.f32.xlu2 %v608_v26  ;;  %v2117_v62 = vadd.f32 %v1941_v40, %v460_v57 }
 0x114   :  { %v559_v61 = vmul.f32 %v2052_v63, %v510_v27 }
 0x115   :  { %v496_v9 = vmax.f32 %v2117_v62, 0.0 }
 0x116   :  { %v2084_v31 = vsub.f32 %v487_v8, %v559_v61  ;;  %v459_v8 = vadd.f32 %v431_v55, %v297_v38  ;;  %v189_v54 = vpop.f32.mrf.mxu0  ;;  %v902_v38 = vld [vmem:[%s2814_s7 + $0x8] sm:$0xff] }
 0x117   :  { %v303_v2 = vadd.f32 %v302_v12, %v189_v54  ;;  %v535_v17 = vsel %vm501_vm3, %v496_v9, 0.0 }
 0x118   :  { %v591_v34 = vmul.f32 %v2084_v31, %v2084_v31  ;;  %v2102_v47 = vadd.f32 %v1941_v40, %v459_v8 }
 0x11a   :  { %v611_v42 = vsel %vm501_vm3, %v591_v34, 0.0  ;;  %v495_v58 = vmax.f32 %v2102_v47, 0.0 }
 0x11b   :  { %612 = vadd.xlane.f32.xlu1 %v611_v42  ;;  %v513_v43 = vpop.xlane.xlu1 %512  ;;  %527 = vadd.xlane.f32.xlu2 %v526_v35  ;;  %v903_v35 = vld [vmem:[%s2814_s7 + $0x10] sm:$0xff] }
 0x11c   :  { %v560_v4 = vmul.f32 %v2052_v63, %v513_v43  ;;  %v532_v0 = vsel %vm501_vm3, %v495_v58, 0.0  ;;  %v308_v43 = vpop.f32.mrf.mxu1 }
 0x11e   :  { %v2099_v46 = vsub.f32 %v488_v16, %v560_v4  ;;  %v192_v10 = vpop.f32.mrf.mxu0 }
 0x11f   :  { %v306_v50 = vadd.f32 %v305_v11, %v192_v10 }
 0x120   :  { %v592_v51 = vmul.f32 %v2099_v46, %v2099_v46 }
 0x122   :  { %v614_v53 = vsel %vm501_vm3, %v592_v51, 0.0 }
 0x123   :  { %v516_v56 = vpop.xlane.xlu2 %515  ;;  %530 = vadd.xlane.f32.xlu1 %v529_v49  ;;  %615 = vadd.xlane.f32.xlu0 %v614_v53 }
 0x124   :  { %v561_v16 = vmul.f32 %v2052_v63, %v516_v56 }
 0x126   :  { %v2114_v59 = vsub.f32 %v489_v24, %v561_v16  ;;  %v461_v24 = vadd.f32 %v437_v60, %v303_v2  ;;  %v195_v41 = vpop.f32.mrf.mxu0  ;;  %v311_v16 = vpop.f32.mrf.mxu1 }
 0x127   :  { %v309_v49 = vadd.f32 %v308_v43, %v195_v41 }
 0x128   :  { %v593_v1 = vmul.f32 %v2114_v59, %v2114_v59  ;;  %v2132_v14 = vadd.f32 %v1941_v40, %v461_v24  ;;  %v446_v24 = vpop.f32.mrf.mxu2 }
 0x129   :  { %v463_v56 = vadd.f32 %v443_v45, %v309_v49 }
 0x12a   :  { %v617_v3 = vsel %vm501_vm3, %v593_v1, 0.0  ;;  %v497_v25 = vmax.f32 %v2132_v14, 0.0 }
 0x12b   :  { %v519_v5 = vpop.xlane.xlu2 %518  ;;  %533 = vadd.xlane.f32.xlu0 %v532_v0  ;;  %618 = vadd.xlane.f32.xlu2 %v617_v3  ;;  %v2179_v2 = vadd.f32 %v1941_v40, %v463_v56 }
 0x12c   :  { %v562_v22 = vmul.f32 %v2052_v63, %v519_v5  ;;  %v538_v55 = vsel %vm501_vm3, %v497_v25, 0.0 }
 0x12e   :  { %v2129_v13 = vsub.f32 %v490_v32, %v562_v22  ;;  %v462_v32 = vadd.f32 %v440_v19, %v306_v50  ;;  %v198_v12 = vpop.f32.mrf.mxu0  ;;  %v499_v19 = vmax.f32 %v2179_v2, 0.0 }
 0x12f   :  { %v312_v5 = vadd.f32 %v311_v16, %v198_v12 }
 0x130   :  { %v594_v15 = vmul.f32 %v2129_v13, %v2129_v13  ;;  %v2147_v27 = vadd.f32 %v1941_v40, %v462_v32 }
 0x131   :  { %v464_v50 = vadd.f32 %v446_v24, %v312_v5 }
 0x132   :  { %v620_v21 = vsel %vm501_vm3, %v594_v15, 0.0  ;;  %v498_v34 = vmax.f32 %v2147_v27, 0.0 }
 0x133   :  { %621 = vadd.xlane.f32.xlu1 %v620_v21  ;;  %v522_v23 = vpop.xlane.xlu1 %521  ;;  %536 = vadd.xlane.f32.xlu2 %v535_v17 }
 0x134   :  { %v563_v28 = vmul.f32 %v2052_v63, %v522_v23  ;;  %v541_v36 = vsel %vm501_vm3, %v498_v34, 0.0 }
 0x136   :  { %v2144_v26 = vsub.f32 %v491_v37, %v563_v28  ;;  %v904_v37 = vld [vmem:[%s2814_s7 + $0x18] sm:$0xff] }
 0x137   :  { %969 = vmatpush.msra.mxu3 %v904_v37  ;;  %v544_v37 = vsel %vm501_vm3, %v499_v19, 0.0 }
 0x138   :  { %v595_v61 = vmul.f32 %v2144_v26, %v2144_v26 }
 0x139   :  { %970 = vmatpush.msra.mxu3 %v903_v35 }
 0x13a   :  { %v623_v29 = vsel %vm501_vm3, %v595_v61, 0.0 }
 0x13b   :  { %539 = vadd.xlane.f32.xlu1 %v538_v55  ;;  %624 = vadd.xlane.f32.xlu0 %v623_v29  ;;  %v2192_v29 = vadd.f32 %v1941_v40, %v464_v50  ;;  %v2209_v40 = vld [vmem:[%s2819_s12] ss:$0 sm:$0xff] }
 0x13c   :  { %971 = vmatpush.msra.mxu3 %v902_v38 }
 0x13d   :  { %v500_v49 = vmax.f32 %v2192_v29, 0.0 }
 0x13e   :  { %972 = vmatpush.msra.mxu3 %v901_v39 }
 0x143   :  { %542 = vadd.xlane.f32.xlu0 %v541_v36 }
 0x17e   :  { %v607_v42 = vpop.xlane.xlu0 %606 }
 0x17f   :  { %v653_v4 = vmul.f32 %v607_v42, %v2052_v63 }
 0x181   :  { %v669_v8 = vadd.f32 1e-05, %v653_v4 }
 0x183   :  { %1621 = vrsqrt.f32 %v669_v8  ;;  %vm691_vm6 = vweird.f32 %v669_v8 }
 0x186   :  { %v610_v51 = vpop.xlane.xlu2 %609  ;;  %v525_v52 = vpop.xlane.xlu0 %524 }
 0x187   :  { %v654_v53 = vmul.f32 %v610_v51, %v2052_v63  ;;  %v564_v54 = vmul.f32 %v2052_v63, %v525_v52 }
 0x189   :  { %v1622_v57 = vpop.eup %1621  ;;  %v670_v60 = vadd.f32 1e-05, %v654_v53  ;;  %v2176_v0 = vsub.f32 %v492_v18, %v564_v54 }
 0x18a   :  { %v686_v1 = vmul.f32 %v1622_v57, %v669_v8  ;;  %vm692_vm5 = vweird.f32 %v1622_v57 }
 0x18b   :  { %1623 = vrsqrt.f32 %v670_v60  ;;  %v596_v3 = vmul.f32 %v2176_v0, %v2176_v0  ;;  %vm693_vm7 = vmor %vm691_vm6, %vm692_vm5  ;;  %vm701_vm9 = vweird.f32 %v670_v60 }
 0x18c   :  { %v687_v22 = vmul.f32 %v1622_v57, %v686_v1 }
 0x18d   :  { %v626_v10 = vsel %vm501_vm3, %v596_v3, 0.0 }
 0x18e   :  { %v688_v11 = vmul.f32 0.5, %v687_v22  ;;  %v613_v15 = vpop.xlane.xlu1 %612  ;;  %v528_v17 = vpop.xlane.xlu2 %527  ;;  %627 = vadd.xlane.f32.xlu2 %v626_v10 }
 0x18f   :  { %v655_v7 = vmul.f32 %v613_v15, %v2052_v63  ;;  %v565_v18 = vmul.f32 %v2052_v63, %v528_v17 }
 0x190   :  { %v689_v21 = vsub.f32 1.5, %v688_v11 }
 0x191   :  { %v1624_v23 = vpop.eup %1623  ;;  %v671_v28 = vadd.f32 1e-05, %v655_v7  ;;  %v2189_v32 = vsub.f32 %v493_v30, %v565_v18 }
 0x192   :  { %v690_v55 = vmul.f32 %v1622_v57, %v689_v21  ;;  %v696_v61 = vmul.f32 %v1624_v23, %v670_v60  ;;  %vm702_vm8 = vweird.f32 %v1624_v23 }
 0x193   :  { %1625 = vrsqrt.f32 %v671_v28  ;;  %v597_v36 = vmul.f32 %v2189_v32, %v2189_v32  ;;  %vm703_vm10 = vmor %vm701_vm9, %vm702_vm8  ;;  %vm711_vm12 = vweird.f32 %v671_v28 }
 0x194   :  { %v694_v30 = vsel %vm693_vm7, %v1622_v57, %v690_v55  ;;  %v697_v35 = vmul.f32 %v1624_v23, %v696_v61  ;;  %v547_v57 = vsel %vm501_vm3, %v500_v49, 0.0 }
 0x195   :  { %v629_v38 = vsel %vm501_vm3, %v597_v36, 0.0  ;;  %v845_v39 = vmul.f32 %v694_v30, %v2057_v6 }
 0x196   :  { %v698_v41 = vmul.f32 0.5, %v697_v35  ;;  %v531_v42 = vpop.xlane.xlu1 %530  ;;  %630 = vadd.xlane.f32.xlu1 %v629_v38  ;;  %545 = vadd.xlane.f32.xlu2 %v544_v37  ;;  %v616_v43 = vpop.xlane.xlu0 %615 }
 0x197   :  { %v566_v4 = vmul.f32 %v2052_v63, %v531_v42  ;;  %v656_v8 = vmul.f32 %v616_v43, %v2052_v63  ;;  %v865_v45 = vmul.f32 %v2202_v20, %v845_v39 }
 0x198   :  { %v699_v51 = vsub.f32 1.5, %v698_v41 }
 0x199   :  { %v1626_v6 = vpop.eup %1625  ;;  %v2217_v52 = vsub.f32 %v494_v44, %v566_v4  ;;  %v672_v53 = vadd.f32 1e-05, %v656_v8  ;;  %v885_v54 = vadd.f32 %v2209_v40, %v865_v45 }
 0x19a   :  { %v700_v56 = vmul.f32 %v1624_v23, %v699_v51  ;;  %v706_v12 = vmul.f32 %v1626_v6, %v671_v28  ;;  %vm712_vm11 = vweird.f32 %v1626_v6 }
 0x19b   :  { %1627 = vrsqrt.f32 %v672_v53  ;;  %1575 = vmatmul.msk.f32.vlgmr.msra.gmra.mxu3 %vm501_vm3, %v885_v54  ;;  %v598_v16 = vmul.f32 %v2217_v52, %v2217_v52  ;;  %vm713_vm13 = vmor %vm711_vm12, %vm712_vm11  ;;  %vm721_vm15 = vweird.f32 %v672_v53 }
 0x19c   :  { %v704_v33 = vsel %vm703_vm10, %v1624_v23, %v700_v56  ;;  %v707_v44 = vmul.f32 %v1626_v6, %v706_v12 }
 0x19d   :  { %v632_v1 = vsel %vm501_vm3, %v598_v16, 0.0  ;;  %v846_v3 = vmul.f32 %v704_v33, %v2069_v48 }
 0x19e   :  { %v708_v5 = vmul.f32 0.5, %v707_v44  ;;  %633 = vadd.xlane.f32.xlu0 %v632_v1  ;;  %548 = vadd.xlane.f32.xlu1 %v547_v57  ;;  %v619_v60 = vpop.xlane.xlu2 %618  ;;  %v534_v22 = vpop.xlane.xlu0 %533 }
 0x19f   :  { %v657_v24 = vmul.f32 %v619_v60, %v2052_v63  ;;  %v567_v10 = vmul.f32 %v2052_v63, %v534_v22  ;;  %v866_v11 = vmul.f32 %v2202_v20, %v846_v3 }
 0x1a0   :  { %v709_v15 = vsub.f32 1.5, %v708_v5 }
 0x1a1   :  { %v1628_v17 = vpop.eup %1627  ;;  %v673_v7 = vadd.f32 1e-05, %v657_v24  ;;  %v2233_v18 = vsub.f32 %v495_v58, %v567_v10  ;;  %v886_v48 = vadd.f32 %v2209_v40, %v866_v11 }
 0x1a2   :  { %v710_v50 = vmul.f32 %v1626_v6, %v709_v15  ;;  %v716_v21 = vmul.f32 %v1628_v17, %v672_v53  ;;  %vm722_vm14 = vweird.f32 %v1628_v17 }
 0x1a3   :  { %1629 = vrsqrt.f32 %v673_v7  ;;  %1576 = vmatmul.msk.f32.gmra.mxu3 %vm501_vm3, %v886_v48  ;;  %v599_v23 = vmul.f32 %v2233_v18, %v2233_v18  ;;  %vm723_vm0 = vmor %vm721_vm15, %vm722_vm14  ;;  %vm731_vm2 = vweird.f32 %v673_v7 }
 0x1a4   :  { %v714_v55 = vsel %vm713_vm13, %v1626_v6, %v710_v50  ;;  %v717_v61 = vmul.f32 %v1628_v17, %v716_v21 }
 0x1a5   :  { %v635_v36 = vsel %vm501_vm3, %v599_v23, 0.0  ;;  %v847_v47 = vmul.f32 %v714_v55, %v2084_v31 }
 0x1a6   :  { %v718_v58 = vmul.f32 0.5, %v717_v61  ;;  %v622_v37 = vpop.xlane.xlu1 %621  ;;  %v537_v30 = vpop.xlane.xlu2 %536  ;;  %636 = vadd.xlane.f32.xlu2 %v635_v36 }
 0x1a7   :  { %v658_v28 = vmul.f32 %v622_v37, %v2052_v63  ;;  %v568_v35 = vmul.f32 %v2052_v63, %v537_v30  ;;  %v867_v38 = vmul.f32 %v2202_v20, %v847_v47 }
 0x1a8   :  { %v719_v39 = vsub.f32 1.5, %v718_v58 }
 0x1a9   :  { %v1630_v41 = vpop.eup %1629  ;;  %v674_v42 = vadd.f32 1e-05, %v658_v28  ;;  %v2246_v43 = vsub.f32 %v496_v9, %v568_v35  ;;  %v887_v31 = vadd.f32 %v2209_v40, %v867_v38 }
 0x1aa   :  { %v720_v4 = vmul.f32 %v1628_v17, %v719_v39  ;;  %v726_v8 = vmul.f32 %v1630_v41, %v673_v7  ;;  %vm732_vm1 = vweird.f32 %v1630_v41 }
 0x1ab   :  { %1631 = vrsqrt.f32 %v674_v42  ;;  %1577 = vmatmul.msk.f32.gmra.mxu3 %vm501_vm3, %v887_v31  ;;  %v600_v45 = vmul.f32 %v2246_v43, %v2246_v43  ;;  %vm733_vm4 = vmor %vm731_vm2, %vm732_vm1  ;;  %vm741_vm6 = vweird.f32 %v674_v42 }
 0x1ac   :  { %v724_v51 = vsel %vm723_vm0, %v1628_v17, %v720_v4  ;;  %v727_v6 = vmul.f32 %v1630_v41, %v726_v8 }
 0x1ad   :  { %v638_v54 = vsel %vm501_vm3, %v600_v45, 0.0  ;;  %v848_v62 = vmul.f32 %v724_v51, %v2099_v46 }
 0x1ae   :  { %v728_v9 = vmul.f32 0.5, %v727_v6  ;;  %v540_v56 = vpop.xlane.xlu1 %539  ;;  %639 = vadd.xlane.f32.xlu0 %v638_v54  ;;  %v625_v12 = vpop.xlane.xlu0 %624 }
 0x1af   :  { %v569_v53 = vmul.f32 %v2052_v63, %v540_v56  ;;  %v659_v16 = vmul.f32 %v625_v12, %v2052_v63  ;;  %v868_v57 = vmul.f32 %v2202_v20, %v848_v62 }
 0x1b0   :  { %v729_v33 = vsub.f32 1.5, %v728_v9 }
 0x1b1   :  { %v1632_v44 = vpop.eup %1631  ;;  %v2259_v1 = vsub.f32 %v497_v25, %v569_v53  ;;  %v675_v3 = vadd.f32 1e-05, %v659_v16  ;;  %v888_v46 = vadd.f32 %v2209_v40, %v868_v57 }
 0x1b2   :  { %v730_v5 = vmul.f32 %v1630_v41, %v729_v33  ;;  %v736_v60 = vmul.f32 %v1632_v44, %v674_v42  ;;  %vm742_vm5 = vweird.f32 %v1632_v44 }
 0x1b3   :  { %1633 = vrsqrt.f32 %v675_v3  ;;  %1578 = vmatmul.msk.f32.gmra.mxu3 %vm501_vm3, %v888_v46  ;;  %v601_v22 = vmul.f32 %v2259_v1, %v2259_v1  ;;  %vm743_vm7 = vmor %vm741_vm6, %vm742_vm5  ;;  %vm751_vm9 = vweird.f32 %v675_v3 }
 0x1b4   :  { %v734_v24 = vsel %vm733_vm4, %v1630_v41, %v730_v5  ;;  %v737_v10 = vmul.f32 %v1632_v44, %v736_v60 }
 0x1b5   :  { %v641_v11 = vsel %vm501_vm3, %v601_v22, 0.0  ;;  %v849_v14 = vmul.f32 %v734_v24, %v2114_v59 }
 0x1b6   :  { %v738_v25 = vmul.f32 0.5, %v737_v10  ;;  %642 = vadd.xlane.f32.xlu1 %v641_v11  ;;  %v543_v15 = vpop.xlane.xlu0 %542 }
 0x1b7   :  { %v570_v17 = vmul.f32 %v2052_v63, %v543_v15  ;;  %v869_v7 = vmul.f32 %v2202_v20, %v849_v14 }
 0x1b8   :  { %v739_v48 = vsub.f32 1.5, %v738_v25 }
 0x1b9   :  { %v1634_v50 = vpop.eup %1633  ;;  %v2271_v21 = vsub.f32 %v498_v34, %v570_v17  ;;  %v889_v23 = vadd.f32 %v2209_v40, %v869_v7 }
 0x1ba   :  { %v740_v55 = vmul.f32 %v1632_v44, %v739_v48  ;;  %v746_v61 = vmul.f32 %v1634_v50, %v675_v3  ;;  %vm752_vm8 = vweird.f32 %v1634_v50 }
 0x1bb   :  { %1579 = vmatmul.msk.f32.gmra.mxu3 %vm501_vm3, %v889_v23  ;;  %v602_v59 = vmul.f32 %v2271_v21, %v2271_v21  ;;  %vm753_vm10 = vmor %vm751_vm9, %vm752_vm8 }
 0x1bc   :  { %v744_v36 = vsel %vm743_vm7, %v1632_v44, %v740_v55  ;;  %v747_v47 = vmul.f32 %v1634_v50, %v746_v61 }
 0x1bd   :  { %v644_v58 = vsel %vm501_vm3, %v602_v59, 0.0  ;;  %v850_v37 = vmul.f32 %v744_v36, %v2129_v13 }
 0x1be   :  { %v748_v27 = vmul.f32 0.5, %v747_v47  ;;  %645 = vadd.xlane.f32.xlu2 %v644_v58 }
 0x1bf   :  { %v870_v34 = vmul.f32 %v2202_v20, %v850_v37 }
 0x1c0   :  { %v749_v30 = vsub.f32 1.5, %v748_v27 }
 0x1c1   :  { %v890_v28 = vadd.f32 %v2209_v40, %v870_v34 }
 0x1c2   :  { %v750_v35 = vmul.f32 %v1634_v50, %v749_v30 }
 0x1c3   :  { %1580 = vmatmul.msk.f32.gmra.mxu3 %vm501_vm3, %v890_v28 }
 0x1c4   :  { %v754_v38 = vsel %vm753_vm10, %v1634_v50, %v750_v35 }
 0x1c5   :  { %v851_v39 = vmul.f32 %v754_v38, %v2144_v26 }
 0x1c7   :  { %v871_v41 = vmul.f32 %v2202_v20, %v851_v39 }
 0x1c9   :  { %v891_v13 = vadd.f32 %v2209_v40, %v871_v41 }
 0x1cb   :  { %1581 = vmatmul.msk.f32.gmra.mxu3 %vm501_vm3, %v891_v13 }
 0x201   :  { %v628_v42 = vpop.xlane.xlu2 %627 }
 0x202   :  { %v660_v31 = vmul.f32 %v628_v42, %v2052_v63 }
 0x204   :  { %v676_v4 = vadd.f32 1e-05, %v660_v31 }
 0x206   :  { %1635 = vrsqrt.f32 %v676_v4  ;;  %vm761_vm12 = vweird.f32 %v676_v4 }
 0x209   :  { %v631_v8 = vpop.xlane.xlu1 %630  ;;  %v546_v45 = vpop.xlane.xlu2 %545 }
 0x20a   :  { %v661_v51 = vmul.f32 %v631_v8, %v2052_v63  ;;  %v571_v6 = vmul.f32 %v2052_v63, %v546_v45 }
 0x20c   :  { %v1636_v54 = vpop.eup %1635  ;;  %v677_v62 = vadd.f32 1e-05, %v661_v51  ;;  %v2291_v26 = vsub.f32 %v499_v19, %v571_v6 }
 0x20d   :  { %v756_v9 = vmul.f32 %v1636_v54, %v676_v4  ;;  %vm762_vm11 = vweird.f32 %v1636_v54 }
 0x20e   :  { %1637 = vrsqrt.f32 %v677_v62  ;;  %v603_v56 = vmul.f32 %v2291_v26, %v2291_v26  ;;  %vm763_vm13 = vmor %vm761_vm12, %vm762_vm11  ;;  %vm771_vm15 = vweird.f32 %v677_v62 }
 0x20f   :  { %v757_v12 = vmul.f32 %v1636_v54, %v756_v9 }
 0x210   :  { %v647_v53 = vsel %vm501_vm3, %v603_v56, 0.0 }
 0x211   :  { %v758_v16 = vmul.f32 0.5, %v757_v12  ;;  %v549_v57 = vpop.xlane.xlu1 %548  ;;  %648 = vadd.xlane.f32.xlu0 %v647_v53  ;;  %v634_v33 = vpop.xlane.xlu0 %633 }
 0x212   :  { %v572_v44 = vmul.f32 %v2052_v63, %v549_v57  ;;  %v662_v3 = vmul.f32 %v634_v33, %v2052_v63 }
 0x213   :  { %v759_v46 = vsub.f32 1.5, %v758_v16 }
 0x214   :  { %v1638_v2 = vpop.eup %1637  ;;  %v2300_v19 = vsub.f32 %v500_v49, %v572_v44  ;;  %v678_v5 = vadd.f32 1e-05, %v662_v3 }
 0x215   :  { %v760_v60 = vmul.f32 %v1636_v54, %v759_v46  ;;  %v766_v22 = vmul.f32 %v1638_v2, %v677_v62  ;;  %vm772_vm14 = vweird.f32 %v1638_v2 }
 0x216   :  { %1639 = vrsqrt.f32 %v678_v5  ;;  %v604_v24 = vmul.f32 %v2300_v19, %v2300_v19  ;;  %vm773_vm0 = vmor %vm771_vm15, %vm772_vm14  ;;  %vm781_vm2 = vweird.f32 %v678_v5 }
 0x217   :  { %v764_v10 = vsel %vm763_vm13, %v1636_v54, %v760_v60  ;;  %v767_v11 = vmul.f32 %v1638_v2, %v766_v22 }
 0x218   :  { %v650_v14 = vsel %vm501_vm3, %v604_v24, 0.0  ;;  %v852_v25 = vmul.f32 %v764_v10, %v2176_v0 }
 0x219   :  { %v768_v15 = vmul.f32 0.5, %v767_v11  ;;  %651 = vadd.xlane.f32.xlu1 %v650_v14  ;;  %v637_v29 = vpop.xlane.xlu2 %636 }
 0x21a   :  { %v663_v49 = vmul.f32 %v637_v29, %v2052_v63  ;;  %v872_v17 = vmul.f32 %v2202_v20, %v852_v25 }
 0x21b   :  { %v769_v7 = vsub.f32 1.5, %v768_v15 }
 0x21c   :  { %v1640_v48 = vpop.eup %1639  ;;  %v679_v50 = vadd.f32 1e-05, %v663_v49  ;;  %v892_v23 = vadd.f32 %v2209_v40, %v872_v17 }
 0x21d   :  { %v770_v55 = vmul.f32 %v1638_v2, %v769_v7  ;;  %v776_v61 = vmul.f32 %v1640_v48, %v678_v5  ;;  %vm782_vm1 = vweird.f32 %v1640_v48 }
 0x21e   :  { %1641 = vrsqrt.f32 %v679_v50  ;;  %1582 = vmatmul.msk.f32.gmra.mxu3 %vm501_vm3, %v892_v23  ;;  %vm783_vm4 = vmor %vm781_vm2, %vm782_vm1  ;;  %vm791_vm6 = vweird.f32 %v679_v50 }
 0x21f   :  { %v774_v0 = vsel %vm773_vm0, %v1638_v2, %v770_v55  ;;  %v777_v59 = vmul.f32 %v1640_v48, %v776_v61 }
 0x220   :  { %v853_v36 = vmul.f32 %v774_v0, %v2189_v32 }
 0x221   :  { %v778_v47 = vmul.f32 0.5, %v777_v59  ;;  %v640_v58 = vpop.xlane.xlu0 %639 }
 0x222   :  { %v664_v37 = vmul.f32 %v640_v58, %v2052_v63  ;;  %v873_v27 = vmul.f32 %v2202_v20, %v853_v36 }
 0x223   :  { %v779_v34 = vsub.f32 1.5, %v778_v47 }
 0x224   :  { %v1642_v30 = vpop.eup %1641  ;;  %v680_v28 = vadd.f32 1e-05, %v664_v37  ;;  %v893_v35 = vadd.f32 %v2209_v40, %v873_v27 }
 0x225   :  { %v780_v38 = vmul.f32 %v1640_v48, %v779_v34  ;;  %v786_v39 = vmul.f32 %v1642_v30, %v679_v50  ;;  %vm792_vm5 = vweird.f32 %v1642_v30 }
 0x226   :  { %1643 = vrsqrt.f32 %v680_v28  ;;  %1583 = vmatmul.msk.f32.gmra.mxu3 %vm501_vm3, %v893_v35  ;;  %vm793_vm7 = vmor %vm791_vm6, %vm792_vm5  ;;  %vm801_vm9 = vweird.f32 %v680_v28 }
 0x227   :  { %v784_v32 = vsel %vm783_vm4, %v1640_v48, %v780_v38  ;;  %v787_v41 = vmul.f32 %v1642_v30, %v786_v39 }
 0x228   :  { %v854_v13 = vmul.f32 %v784_v32, %v2217_v52 }
 0x229   :  { %v788_v42 = vmul.f32 0.5, %v787_v41  ;;  %v643_v31 = vpop.xlane.xlu1 %642 }
 0x22a   :  { %v665_v4 = vmul.f32 %v643_v31, %v2052_v63  ;;  %v874_v8 = vmul.f32 %v2202_v20, %v854_v13 }
 0x22b   :  { %v789_v45 = vsub.f32 1.5, %v788_v42 }
 0x22c   :  { %v1644_v51 = vpop.eup %1643  ;;  %v681_v6 = vadd.f32 1e-05, %v665_v4  ;;  %v894_v54 = vadd.f32 %v2209_v40, %v874_v8 }
 0x22d   :  { %v790_v62 = vmul.f32 %v1642_v30, %v789_v45  ;;  %v796_v9 = vmul.f32 %v1644_v51, %v680_v28  ;;  %vm802_vm8 = vweird.f32 %v1644_v51 }
 0x22e   :  { %1645 = vrsqrt.f32 %v681_v6  ;;  %1584 = vmatmul.msk.f32.gmra.mxu3 %vm501_vm3, %v894_v54  ;;  %vm803_vm10 = vmor %vm801_vm9, %vm802_vm8  ;;  %vm811_vm12 = vweird.f32 %v681_v6 }
 0x22f   :  { %v794_v52 = vsel %vm793_vm7, %v1642_v30, %v790_v62  ;;  %v797_v56 = vmul.f32 %v1644_v51, %v796_v9 }
 0x230   :  { %v855_v12 = vmul.f32 %v794_v52, %v2233_v18 }
 0x231   :  { %v798_v53 = vmul.f32 0.5, %v797_v56  ;;  %v646_v16 = vpop.xlane.xlu2 %645 }
 0x232   :  { %v666_v57 = vmul.f32 %v646_v16, %v2052_v63  ;;  %v875_v33 = vmul.f32 %v2202_v20, %v855_v12 }
 0x233   :  { %v799_v44 = vsub.f32 1.5, %v798_v53 }
 0x234   :  { %v1646_v3 = vpop.eup %1645  ;;  %v682_v46 = vadd.f32 1e-05, %v666_v57  ;;  %v895_v2 = vadd.f32 %v2209_v40, %v875_v33 }
 0x235   :  { %v800_v5 = vmul.f32 %v1644_v51, %v799_v44  ;;  %v806_v60 = vmul.f32 %v1646_v3, %v681_v6  ;;  %vm812_vm11 = vweird.f32 %v1646_v3 }
 0x236   :  { %1647 = vrsqrt.f32 %v682_v46  ;;  %1585 = vmatmul.msk.f32.gmra.mxu3 %vm501_vm3, %v895_v2  ;;  %vm813_vm13 = vmor %vm811_vm12, %vm812_vm11  ;;  %vm821_vm15 = vweird.f32 %v682_v46 }
 0x237   :  { %v804_v18 = vsel %vm803_vm10, %v1644_v51, %v800_v5  ;;  %v807_v22 = vmul.f32 %v1646_v3, %v806_v60 }
 0x238   :  { %v856_v24 = vmul.f32 %v804_v18, %v2246_v43 }
 0x239   :  { %v808_v10 = vmul.f32 0.5, %v807_v22  ;;  %v2362_v22 = vld [vmem:[%s2815_s8] ss:$0 sm:$0xff] }
 0x23a   :  { %v876_v11 = vmul.f32 %v2202_v20, %v856_v24 }
 0x23b   :  { %v809_v14 = vsub.f32 1.5, %v808_v10 }
 0x23c   :  { %v1648_v25 = vpop.eup %1647  ;;  %v896_v15 = vadd.f32 %v2209_v40, %v876_v11 }
 0x23d   :  { %v810_v29 = vmul.f32 %v1646_v3, %v809_v14  ;;  %v816_v49 = vmul.f32 %v1648_v25, %v682_v46  ;;  %vm822_vm14 = vweird.f32 %v1648_v25 }
 0x23e   :  { %1586 = vmatmul.msk.f32.gmra.mxu3 %vm501_vm3, %v896_v15  ;;  %vm823_vm0 = vmor %vm821_vm15, %vm822_vm14 }
 0x23f   :  { %v814_v17 = vsel %vm813_vm13, %v1646_v3, %v810_v29  ;;  %v817_v7 = vmul.f32 %v1648_v25, %v816_v49 }
 0x240   :  { %v857_v48 = vmul.f32 %v814_v17, %v2259_v1  ;;  %v2337_v1 = vpop.f32.mrf.mxu3 }
 0x241   :  { %v818_v50 = vmul.f32 0.5, %v817_v7 }
 0x242   :  { %v877_v43 = vmul.f32 %v2202_v20, %v857_v48 }
 0x243   :  { %v819_v23 = vsub.f32 1.5, %v818_v50 }
 0x244   :  { %v897_v55 = vadd.f32 %v2209_v40, %v877_v43 }
 0x245   :  { %v820_v61 = vmul.f32 %v1648_v25, %v819_v23 }
 0x246   :  { %1587 = vmatmul.msk.f32.gmra.mxu3 %vm501_vm3, %v897_v55 }
 0x247   :  { %v824_v0 = vsel %vm823_vm0, %v1648_v25, %v820_v61 }
 0x248   :  { %v858_v59 = vmul.f32 %v824_v0, %v2271_v21  ;;  %v2339_v58 = vpop.f32.mrf.mxu3 }
 0x24a   :  { %v878_v36 = vmul.f32 %v2202_v20, %v858_v59 }
 0x24c   :  { %v898_v47 = vadd.f32 %v2209_v40, %v878_v36 }
 0x24e   :  { %1588 = vmatmul.msk.f32.gmra.mxu3 %vm501_vm3, %v898_v47 }
 0x250   :  { %v2341_v37 = vpop.f32.mrf.mxu3 }
 0x258   :  { %v2343_v27 = vpop.f32.mrf.mxu3 }
 0x260   :  { %v986_v30 = vpop.f32.mrf.mxu3 }
 0x261   :  { %v2378_v29 = vadd.f32 %v2362_v22, %v986_v30 }
 0x263   :  { %v1026_v17 = vmax.f32 %v2378_v29, 0.0 }
 0x265   :  { %v1050_v7 = vsel %vm501_vm3, %v1026_v17, 0.0 }
 0x268   :  { %v2347_v32 = vpop.f32.mrf.mxu3 }
 0x270   :  { %v2349_v6 = vpop.f32.mrf.mxu3 }
 0x284   :  { %v649_v34 = vpop.xlane.xlu0 %648 }
 0x285   :  { %v667_v28 = vmul.f32 %v649_v34, %v2052_v63 }
 0x287   :  { %v683_v35 = vadd.f32 1e-05, %v667_v28 }
 0x289   :  { %1649 = vrsqrt.f32 %v683_v35  ;;  %vm831_vm2 = vweird.f32 %v683_v35 }
 0x28c   :  { %v652_v21 = vpop.xlane.xlu1 %651 }
 0x28d   :  { %v668_v38 = vmul.f32 %v652_v21, %v2052_v63 }
 0x28f   :  { %v1650_v39 = vpop.eup %1649  ;;  %v684_v41 = vadd.f32 1e-05, %v668_v38  ;;  %v2403_v38 = vadd.f32 %v2362_v22, %v2347_v32  ;;  %v2418_v32 = vadd.f32 %v2362_v22, %v2349_v6 }
 0x290   :  { %v826_v13 = vmul.f32 %v1650_v39, %v683_v35  ;;  %vm832_vm1 = vweird.f32 %v1650_v39 }
 0x291   :  { %1651 = vrsqrt.f32 %v684_v41  ;;  %vm833_vm4 = vmor %vm831_vm2, %vm832_vm1  ;;  %vm841_vm6 = vweird.f32 %v684_v41 }
 0x292   :  { %v827_v42 = vmul.f32 %v1650_v39, %v826_v13 }
 0x294   :  { %v828_v31 = vmul.f32 0.5, %v827_v42  ;;  %v1027_v42 = vmax.f32 %v2403_v38, 0.0 }
 0x296   :  { %v829_v4 = vsub.f32 1.5, %v828_v31 }
 0x297   :  { %v1652_v8 = vpop.eup %1651 }
 0x298   :  { %v830_v45 = vmul.f32 %v1650_v39, %v829_v4  ;;  %v836_v51 = vmul.f32 %v1652_v8, %v684_v41  ;;  %vm842_vm5 = vweird.f32 %v1652_v8  ;;  %v2414_v4 = vadd.f32 %v2362_v22, %v2343_v27 }
 0x299   :  { %vm843_vm7 = vmor %vm841_vm6, %vm842_vm5 }
 0x29a   :  { %v834_v54 = vsel %vm833_vm4, %v1650_v39, %v830_v45  ;;  %v837_v62 = vmul.f32 %v1652_v8, %v836_v51  ;;  %v1053_v45 = vsel %vm501_vm3, %v1027_v42, 0.0  ;;  %v1025_v51 = vmax.f32 %v2414_v4, 0.0 }
 0x29b   :  { %v859_v9 = vmul.f32 %v834_v54, %v2291_v26  ;;  %v1028_v54 = vmax.f32 %v2418_v32, 0.0 }
 0x29c   :  { %v838_v52 = vmul.f32 0.5, %v837_v62  ;;  %v1047_v6 = vsel %vm501_vm3, %v1025_v51, 0.0 }
 0x29d   :  { %v879_v56 = vmul.f32 %v2202_v20, %v859_v9  ;;  %v1056_v27 = vsel %vm501_vm3, %v1028_v54, 0.0 }
 0x29e   :  { %v839_v12 = vsub.f32 1.5, %v838_v52 }
 0x29f   :  { %v899_v53 = vadd.f32 %v2209_v40, %v879_v56 }
 0x2a0   :  { %v840_v16 = vmul.f32 %v1652_v8, %v839_v12  ;;  %v2439_v12 = vadd.f32 %v2362_v22, %v2337_v1  ;;  %v2453_v1 = vadd.f32 %v2362_v22, %v2339_v58  ;;  %v2465_v58 = vadd.f32 %v2362_v22, %v2341_v37 }
 0x2a1   :  { %v995_v57 = vpop.f32.mrf.mxu3  ;;  %1589 = vmatmul.msk.f32.gmra.mxu3 %vm501_vm3, %v899_v53 }
 0x2a2   :  { %v844_v33 = vsel %vm843_vm7, %v1652_v8, %v840_v16  ;;  %v2371_v14 = vadd.f32 %v2362_v22, %v995_v57  ;;  %v1022_v16 = vmax.f32 %v2439_v12, 0.0 }
 0x2a3   :  { %v860_v44 = vmul.f32 %v844_v33, %v2300_v19 }
 0x2a4   :  { %v1029_v15 = vmax.f32 %v2371_v14, 0.0  ;;  %v1038_v57 = vsel %vm501_vm3, %v1022_v16, 0.0 }
 0x2a5   :  { %v880_v3 = vmul.f32 %v2202_v20, %v860_v44 }
 0x2a6   :  { %v1059_v49 = vsel %vm501_vm3, %v1029_v15, 0.0 }
 0x2a7   :  { %v900_v26 = vadd.f32 %v2209_v40, %v880_v3 }
 0x2a9   :  { %v998_v46 = vpop.f32.mrf.mxu3  ;;  %1590 = vmatmul.msk.f32.gmra.mxu3 %vm501_vm3, %v900_v26 }
 0x2aa   :  { %v2392_v47 = vadd.f32 %v2362_v22, %v998_v46 }
 0x2ac   :  { %v1030_v35 = vmax.f32 %v2392_v47, 0.0 }
 0x2ae   :  { %v1062_v13 = vsel %vm501_vm3, %v1030_v35, 0.0 }
 0x2b1   :  { %v1001_v2 = vpop.f32.mrf.mxu3 }
 0x2b2   :  { %v2406_v39 = vadd.f32 %v2362_v22, %v1001_v2 }
 0x2b4   :  { %v1031_v31 = vmax.f32 %v2406_v39, 0.0 }
 0x2b6   :  { %v1065_v8 = vsel %vm501_vm3, %v1031_v31, 0.0 }
 0x2b9   :  { %v1004_v5 = vpop.f32.mrf.mxu3 }
 0x2ba   :  { %v2366_v20 = vadd.f32 %v2362_v22, %v1004_v5 }
 0x2bc   :  { %v1032_v11 = vmax.f32 %v2366_v20, 0.0 }
 0x2be   :  { %v1068_v25 = vsel %vm501_vm3, %v1032_v11, 0.0 }
 0x2c1   :  { %v1007_v60 = vpop.f32.mrf.mxu3 }
 0x2c2   :  { %v1008_v23 = vadd.f32 %v2362_v22, %v1007_v60 }
 0x2c4   :  { %v1033_v0 = vmax.f32 %v1008_v23, 0.0 }
 0x2c6   :  { %v1071_v28 = vsel %vm501_vm3, %v1033_v0, 0.0 }
 0x2c9   :  { %v1010_v18 = vpop.f32.mrf.mxu3 }
 0x2ca   :  { %v2395_v34 = vadd.f32 %v2362_v22, %v1010_v18  ;;  %v1023_v18 = vmax.f32 %v2453_v1, 0.0 }
 0x2cc   :  { %v1034_v21 = vmax.f32 %v2395_v34, 0.0 }
 0x2ce   :  { %v1074_v41 = vsel %vm501_vm3, %v1034_v21, 0.0 }
 0x2d1   :  { %v1013_v24 = vpop.f32.mrf.mxu3 }
 0x2d2   :  { %v1014_v10 = vadd.f32 %v2362_v22, %v1013_v24 }
 0x2d4   :  { %v1035_v19 = vmax.f32 %v1014_v10, 0.0 }
 0x2d6   :  { %v1077_v40 = vsel %vm501_vm3, %v1035_v19, 0.0 }
 0x2d7   :  { %1078 = vadd.xlane.f32.xlu1 %v1077_v40 }
 0x2df   :  { %1069 = vadd.xlane.f32.xlu1 %v1068_v25 }
 0x2e7   :  { %1060 = vadd.xlane.f32.xlu1 %v1059_v49  ;;  %v1041_v49 = vsel %vm501_vm3, %v1023_v18, 0.0 }
 0x2ef   :  { %1051 = vadd.xlane.f32.xlu1 %v1050_v7 }
 0x324   :  { %v1016_v48 = vpop.f32.mrf.mxu3 }
 0x325   :  { %v1017_v50 = vadd.f32 %v2362_v22, %v1016_v48 }
 0x327   :  { %v1036_v43 = vmax.f32 %v1017_v50, 0.0  ;;  %v1024_v50 = vmax.f32 %v2465_v58, 0.0 }
 0x329   :  { %v1080_v55 = vsel %vm501_vm3, %v1036_v43, 0.0 }
 0x32a   :  { %1081 = vadd.xlane.f32.xlu0 %v1080_v55 }
 0x32c   :  { %v1019_v61 = vpop.f32.mrf.mxu3 }
 0x32d   :  { %v1020_v59 = vadd.f32 %v2362_v22, %v1019_v61  ;;  %v1044_v61 = vsel %vm501_vm3, %v1024_v50, 0.0 }
 0x32f   :  { %v1037_v36 = vmax.f32 %v1020_v59, 0.0 }
 0x331   :  { %v1083_v30 = vsel %vm501_vm3, %v1037_v36, 0.0 }
 0x332   :  { %1084 = vadd.xlane.f32.xlu2 %v1083_v30  ;;  %1072 = vadd.xlane.f32.xlu0 %v1071_v28 }
 0x33a   :  { %1075 = vadd.xlane.f32.xlu2 %v1074_v41  ;;  %1063 = vadd.xlane.f32.xlu0 %v1062_v13 }
 0x342   :  { %1066 = vadd.xlane.f32.xlu2 %v1065_v8  ;;  %1054 = vadd.xlane.f32.xlu0 %v1053_v45 }
 0x34a   :  { %v1079_v62 = vpop.xlane.xlu1 %1078  ;;  %1057 = vadd.xlane.f32.xlu2 %v1056_v27  ;;  %1048 = vadd.xlane.f32.xlu0 %v1047_v6 }
 0x34b   :  { %v1099_v9 = vmul.f32 %v1079_v62, %v2052_v63 }
 0x34d   :  { %v2433_v52 = vsub.f32 %v1035_v19, %v1099_v9 }
 0x34f   :  { %v1131_v56 = vmul.f32 %v2433_v52, %v2433_v52 }
 0x351   :  { %v1173_v53 = vsel %vm501_vm3, %v1131_v56, 0.0 }
 0x352   :  { %1174 = vadd.xlane.f32.xlu0 %v1173_v53  ;;  %v1070_v22 = vpop.xlane.xlu1 %1069 }
 0x353   :  { %v1096_v30 = vmul.f32 %v1070_v22, %v2052_v63 }
 0x355   :  { %v2499_v8 = vsub.f32 %v1032_v11, %v1096_v30 }
 0x357   :  { %v1128_v38 = vmul.f32 %v2499_v8, %v2499_v8 }
 0x35a   :  { %1039 = vadd.xlane.f32.xlu0 %v1038_v57  ;;  %v1061_v13 = vpop.xlane.xlu1 %1060 }
 0x35b   :  { %v1093_v20 = vmul.f32 %v1061_v13, %v2052_v63 }
 0x39d   :  { %v1082_v33 = vpop.xlane.xlu0 %1081 }
 0x39e   :  { %v1100_v44 = vmul.f32 %v1082_v33, %v2052_v63  ;;  %v2523_v33 = vsub.f32 %v1029_v15, %v1093_v20 }
 0x3a0   :  { %v2447_v3 = vsub.f32 %v1036_v43, %v1100_v44  ;;  %v1125_v14 = vmul.f32 %v2523_v33, %v2523_v33 }
 0x3a2   :  { %v1132_v26 = vmul.f32 %v2447_v3, %v2447_v3 }
 0x3a4   :  { %v1176_v46 = vsel %vm501_vm3, %v1132_v26, 0.0  ;;  %v1052_v26 = vpop.xlane.xlu1 %1051 }
 0x3a5   :  { %v1085_v2 = vpop.xlane.xlu2 %1084  ;;  %1177 = vadd.xlane.f32.xlu1 %v1176_v46  ;;  %v1073_v5 = vpop.xlane.xlu0 %1072 }
 0x3a6   :  { %v1101_v60 = vmul.f32 %v1085_v2, %v2052_v63  ;;  %v1097_v10 = vmul.f32 %v1073_v5, %v2052_v63  ;;  %v1090_v5 = vmul.f32 %v1052_v26, %v2052_v63 }
 0x3a8   :  { %v2458_v24 = vsub.f32 %v1037_v36, %v1101_v60  ;;  %v2467_v40 = vsub.f32 %v1033_v0, %v1097_v10  ;;  %v2539_v4 = vsub.f32 %v1026_v17, %v1090_v5 }
 0x3aa   :  { %v1133_v19 = vmul.f32 %v2458_v24, %v2458_v24  ;;  %v1129_v37 = vmul.f32 %v2467_v40, %v2467_v40 }
 0x3ac   :  { %v1179_v25 = vsel %vm501_vm3, %v1133_v19, 0.0  ;;  %v1167_v0 = vsel %vm501_vm3, %v1129_v37, 0.0 }
 0x3ad   :  { %1180 = vadd.xlane.f32.xlu2 %v1179_v25  ;;  %v1076_v7 = vpop.xlane.xlu2 %1075  ;;  %1042 = vadd.xlane.f32.xlu1 %v1041_v49  ;;  %v1064_v48 = vpop.xlane.xlu0 %1063  ;;  %v1122_v49 = vmul.f32 %v2539_v4, %v2539_v4 }
 0x3ae   :  { %v1098_v43 = vmul.f32 %v1076_v7, %v2052_v63  ;;  %v1094_v23 = vmul.f32 %v1064_v48, %v2052_v63 }
 0x3af   :  { %v1146_v17 = vsel %vm501_vm3, %v1122_v49, 0.0 }
 0x3b0   :  { %v2478_v55 = vsub.f32 %v1034_v21, %v1098_v43  ;;  %v2484_v59 = vsub.f32 %v1030_v35, %v1094_v23 }
 0x3b2   :  { %v1130_v21 = vmul.f32 %v2478_v55, %v2478_v55  ;;  %v1126_v41 = vmul.f32 %v2484_v59, %v2484_v59 }
 0x3b4   :  { %v1170_v45 = vsel %vm501_vm3, %v1130_v21, 0.0  ;;  %v1158_v62 = vsel %vm501_vm3, %v1126_v41, 0.0 }
 0x3b5   :  { %1045 = vadd.xlane.f32.xlu2 %v1044_v61  ;;  %v1067_v36 = vpop.xlane.xlu2 %1066  ;;  %1168 = vadd.xlane.f32.xlu1 %v1167_v0  ;;  %v1055_v47 = vpop.xlane.xlu0 %1054 }
 0x3b6   :  { %v1095_v34 = vmul.f32 %v1067_v36, %v2052_v63  ;;  %v1091_v39 = vmul.f32 %v1055_v47, %v2052_v63 }
 0x3b8   :  { %v2488_v28 = vsub.f32 %v1031_v31, %v1095_v34  ;;  %v2505_v27 = vsub.f32 %v1027_v42, %v1091_v39 }
 0x3ba   :  { %v1127_v35 = vmul.f32 %v2488_v28, %v2488_v28  ;;  %v1123_v42 = vmul.f32 %v2505_v27, %v2505_v27 }
 0x3bc   :  { %v1161_v31 = vsel %vm501_vm3, %v1127_v35, 0.0  ;;  %v1149_v46 = vsel %vm501_vm3, %v1123_v42, 0.0 }
 0x3bd   :  { %1171 = vadd.xlane.f32.xlu2 %v1170_v45  ;;  %v1058_v6 = vpop.xlane.xlu2 %1057  ;;  %1162 = vadd.xlane.f32.xlu0 %v1161_v31  ;;  %v1049_v9 = vpop.xlane.xlu0 %1048 }
 0x3be   :  { %v1092_v56 = vmul.f32 %v1058_v6, %v2052_v63  ;;  %1159 = vadd.xlane.f32.xlu1 %v1158_v62  ;;  %v1089_v53 = vmul.f32 %v1049_v9, %v2052_v63 }
 0x3c0   :  { %v2512_v11 = vsub.f32 %v1028_v54, %v1092_v56  ;;  %v2527_v32 = vsub.f32 %v1025_v51, %v1089_v53  ;;  %v1164_v54 = vsel %vm501_vm3, %v1128_v38, 0.0  ;;  %v1155_v51 = vsel %vm501_vm3, %v1125_v14, 0.0 }
 0x3c2   :  { %v1124_v57 = vmul.f32 %v2512_v11, %v2512_v11  ;;  %v1121_v15 = vmul.f32 %v2527_v32, %v2527_v32 }
 0x3c4   :  { %v1152_v44 = vsel %vm501_vm3, %v1124_v57, 0.0  ;;  %v1143_v60 = vsel %vm501_vm3, %v1121_v15, 0.0 }
 0x3c5   :  { %1165 = vadd.xlane.f32.xlu2 %v1164_v54  ;;  %1153 = vadd.xlane.f32.xlu0 %v1152_v44  ;;  %v1175_v2 = vpop.xlane.xlu0 %1174 }
 0x3c6   :  { %1150 = vadd.xlane.f32.xlu1 %v1149_v46  ;;  %v1195_v48 = vmul.f32 %v1175_v2, %v2052_v63 }
 0x3c8   :  { %v1211_v43 = vadd.f32 1e-05, %v1195_v48 }
 0x3ca   :  { %1653 = vrsqrt.f32 %v1211_v43  ;;  %vm1350_vm12 = vweird.f32 %v1211_v43 }
 0x3cd   :  { %1156 = vadd.xlane.f32.xlu2 %v1155_v51  ;;  %1144 = vadd.xlane.f32.xlu0 %v1143_v60  ;;  %v1040_v10 = vpop.xlane.xlu0 %1039 }
 0x3ce   :  { %v1086_v19 = vmul.f32 %v1040_v10, %v2052_v63 }
 0x3d0   :  { %v2546_v25 = vsub.f32 %v1022_v16, %v1086_v19  ;;  %v2556_v22 = vpop.eup %1653 }
 0x3d1   :  { %v1345_v0 = vmul.f32 %v2556_v22, %v1211_v43  ;;  %vm1351_vm9 = vweird.f32 %v2556_v22 }
 0x3d2   :  { %v1118_v29 = vmul.f32 %v2546_v25, %v2546_v25  ;;  %vm2597_vm15 = vmor %vm1350_vm12, %vm1351_vm9 }
 0x3d3   :  { %v1346_v41 = vmul.f32 %v2556_v22, %v1345_v0 }
 0x3d4   :  { %v1134_v7 = vsel %vm501_vm3, %v1118_v29, 0.0 }
 0x3d5   :  { %1147 = vadd.xlane.f32.xlu2 %v1146_v17  ;;  %1135 = vadd.xlane.f32.xlu0 %v1134_v7  ;;  %v1347_v9 = vmul.f32 0.5, %v1346_v41 }
 0x3d7   :  { %v1348_v57 = vsub.f32 1.5, %v1347_v9 }
 0x418   :  { %v1178_v37 = vpop.xlane.xlu1 %1177 }
 0x419   :  { %v1196_v12 = vmul.f32 %v1178_v37, %v2052_v63 }
 0x41b   :  { %v1212_v16 = vadd.f32 1e-05, %v1196_v12 }
 0x41d   :  { %1655 = vrsqrt.f32 %v1212_v16  ;;  %vm1360_vm10 = vweird.f32 %v1212_v16 }
 0x420   :  { %v1181_v23 = vpop.xlane.xlu2 %1180  ;;  %v1043_v61 = vpop.xlane.xlu1 %1042 }
 0x421   :  { %v1197_v36 = vmul.f32 %v1181_v23, %v2052_v63  ;;  %v1087_v47 = vmul.f32 %v1043_v61, %v2052_v63 }
 0x423   :  { %v1656_v34 = vpop.eup %1655  ;;  %v1213_v30 = vadd.f32 1e-05, %v1197_v36  ;;  %v2563_v21 = vsub.f32 %v1023_v18, %v1087_v47  ;;  %v2618_v36 = vld [vmem:[%s2820_s13] ss:$0 sm:$0xff] }
 0x424   :  { %v1355_v39 = vmul.f32 %v1656_v34, %v1212_v16  ;;  %vm1361_vm8 = vweird.f32 %v1656_v34 }
 0x425   :  { %1657 = vrsqrt.f32 %v1213_v30  ;;  %v1119_v35 = vmul.f32 %v2563_v21, %v2563_v21  ;;  %vm2589_vm13 = vmor %vm1360_vm10, %vm1361_vm8  ;;  %vm1370_vm14 = vweird.f32 %v1213_v30 }
 0x426   :  { %v1356_v13 = vmul.f32 %v1656_v34, %v1355_v39 }
 0x427   :  { %v1137_v45 = vsel %vm501_vm3, %v1119_v35, 0.0 }
 0x428   :  { %v1357_v31 = vmul.f32 0.5, %v1356_v13  ;;  %v1046_v6 = vpop.xlane.xlu2 %1045  ;;  %1138 = vadd.xlane.f32.xlu2 %v1137_v45  ;;  %v1169_v62 = vpop.xlane.xlu1 %1168 }
 0x429   :  { %v1088_v56 = vmul.f32 %v1046_v6, %v2052_v63  ;;  %v1193_v1 = vmul.f32 %v1169_v62, %v2052_v63 }
 0x42a   :  { %v1358_v38 = vsub.f32 1.5, %v1357_v31 }
 0x42b   :  { %v1658_v18 = vpop.eup %1657  ;;  %v2573_v20 = vsub.f32 %v1024_v50, %v1088_v56  ;;  %v2575_v53 = vadd.f32 1e-05, %v1193_v1  ;;  %v1349_v50 = vmul.f32 %v2556_v22, %v1348_v57 }
 0x42c   :  { %v1365_v42 = vmul.f32 %v1658_v18, %v1213_v30  ;;  %v1359_v46 = vmul.f32 %v1656_v34, %v1358_v38  ;;  %vm1371_vm11 = vweird.f32 %v1658_v18 }
 0x42d   :  { %1659 = vrsqrt.f32 %v2575_v53  ;;  %v1120_v54 = vmul.f32 %v2573_v20, %v2573_v20  ;;  %vm1372_vm0 = vmor %vm1370_vm14, %vm1371_vm11  ;;  %v1353_v16 = vsel %vm2597_vm15, %v2556_v22, %v1349_v50  ;;  %vm1330_vm5 = vweird.f32 %v2575_v53 }
 0x42e   :  { %v1366_v44 = vmul.f32 %v1658_v18, %v1365_v42  ;;  %v1363_v48 = vsel %vm2589_vm13, %v1656_v34, %v1359_v46  ;;  %v1387_v13 = vmul.f32 %v1353_v16, %v2433_v52 }
 0x42f   :  { %v1140_v26 = vsel %vm501_vm3, %v1120_v54, 0.0  ;;  %v1388_v47 = vmul.f32 %v1363_v48, %v2447_v3 }
 0x430   :  { %v1367_v2 = vmul.f32 0.5, %v1366_v44  ;;  %v1172_v5 = vpop.xlane.xlu2 %1171  ;;  %1141 = vadd.xlane.f32.xlu1 %v1140_v26  ;;  %v1163_v58 = vpop.xlane.xlu0 %1162  ;;  %v1407_v52 = vmul.f32 %v2618_v36, %v1387_v13 }
 0x431   :  { %v1194_v14 = vmul.f32 %v1172_v5, %v2052_v63  ;;  %v1160_v15 = vpop.xlane.xlu1 %1159  ;;  %v1191_v51 = vmul.f32 %v1163_v58, %v2052_v63  ;;  %v1408_v9 = vmul.f32 %v2618_v36, %v1388_v47 }
 0x432   :  { %v1368_v60 = vsub.f32 1.5, %v1367_v2  ;;  %v1190_v10 = vmul.f32 %v1160_v15, %v2052_v63 }
 0x433   :  { %v2586_v19 = vpop.eup %1659  ;;  %v2593_v29 = vadd.f32 1e-05, %v1194_v14  ;;  %v2595_v17 = vadd.f32 1e-05, %v1191_v51 }
 0x434   :  { %v1369_v37 = vmul.f32 %v1658_v18, %v1368_v60  ;;  %v1325_v43 = vmul.f32 %v2586_v19, %v2575_v53  ;;  %v2605_v12 = vadd.f32 1e-05, %v1190_v10  ;;  %vm1331_vm2 = vweird.f32 %v2586_v19 }
 0x435   :  { %1661 = vrsqrt.f32 %v2593_v29  ;;  %vm1340_vm4 = vweird.f32 %v2593_v29  ;;  %vm2675_vm7 = vmor %vm1330_vm5, %vm1331_vm2  ;;  %vm1310_vm11 = vweird.f32 %v2595_v17 }
 0x436   :  { %v1373_v23 = vsel %vm1372_vm0, %v1658_v18, %v1369_v37  ;;  %1663 = vrsqrt.f32 %v2605_v12  ;;  %v1326_v61 = vmul.f32 %v2586_v19, %v1325_v43  ;;  %vm1300_vm14 = vweird.f32 %v2605_v12 }
 0x437   :  { %1665 = vrsqrt.f32 %v2595_v17  ;;  %v1389_v0 = vmul.f32 %v1373_v23, %v2458_v24  ;;  %v2627_v24 = vld [vmem:[%s2821_s14] ss:$0 sm:$0xff] }
 0x438   :  { %v1166_v34 = vpop.xlane.xlu2 %1165  ;;  %v1154_v30 = vpop.xlane.xlu0 %1153  ;;  %v1327_v3 = vmul.f32 0.5, %v1326_v61  ;;  %v1428_v46 = vadd.f32 %v2627_v24, %v1408_v9  ;;  %v1427_v15 = vadd.f32 %v2627_v24, %v1407_v52 }
 0x439   :  { %v1192_v22 = vmul.f32 %v1166_v34, %v2052_v63  ;;  %v1151_v39 = vpop.xlane.xlu1 %1150  ;;  %v1188_v41 = vmul.f32 %v1154_v30, %v2052_v63  ;;  %v1409_v35 = vmul.f32 %v2618_v36, %v1389_v0 }
 0x43a   :  { %v1187_v45 = vmul.f32 %v1151_v39, %v2052_v63  ;;  %v1328_v26 = vsub.f32 1.5, %v1327_v3 }
 0x43b   :  { %v1662_v31 = vpop.eup %1661  ;;  %v2631_v6 = vadd.f32 1e-05, %v1192_v22  ;;  %v1429_v62 = vadd.f32 %v2627_v24, %v1409_v35  ;;  %v2638_v18 = vadd.f32 1e-05, %v1188_v41 }
 0x43c   :  { %v2635_v56 = vpop.eup %1663  ;;  %v1335_v1 = vmul.f32 %v1662_v31, %v2593_v29  ;;  %v2649_v44 = vadd.f32 1e-05, %v1187_v45  ;;  %vm1341_vm1 = vweird.f32 %v1662_v31  ;;  %v1329_v49 = vmul.f32 %v2586_v19, %v1328_v26 }
 0x43d   :  { %v2640_v38 = vpop.eup %1665  ;;  %1667 = vrsqrt.f32 %v2631_v6  ;;  %1591 = vmatpush.xpose.msk.msrb.mxu0 %vm501_vm3, %v1429_v62  ;;  %v1295_v57 = vmul.f32 %v2635_v56, %v2605_v12  ;;  %vm2667_vm6 = vmor %vm1340_vm4, %vm1341_vm1  ;;  %vm1320_vm9 = vweird.f32 %v2631_v6  ;;  %vm1301_vm13 = vweird.f32 %v2635_v56 }
 0x43e   :  { %v1336_v42 = vmul.f32 %v1662_v31, %v1335_v1  ;;  %v1305_v54 = vmul.f32 %v2640_v38, %v2595_v17  ;;  %1669 = vrsqrt.f32 %v2638_v18  ;;  %v1333_v53 = vsel %vm2675_vm7, %v2586_v19, %v1329_v49  ;;  %vm2726_vm0 = vmor %vm1300_vm14, %vm1301_vm13 }
 0x43f   :  { %v1296_v60 = vmul.f32 %v2635_v56, %v1295_v57  ;;  %1671 = vrsqrt.f32 %v2649_v44  ;;  %vm1311_vm8 = vweird.f32 %v2640_v38  ;;  %v1385_v62 = vmul.f32 %v1333_v53, %v2467_v40 }
 0x440   :  { %v1337_v2 = vmul.f32 0.5, %v1336_v42  ;;  %v1306_v5 = vmul.f32 %v2640_v38, %v1305_v54  ;;  %v1157_v58 = vpop.xlane.xlu2 %1156  ;;  %v1145_v50 = vpop.xlane.xlu0 %1144  ;;  %vm2713_vm15 = vmor %vm1310_vm11, %vm1311_vm8 }
 0x441   :  { %v1189_v14 = vmul.f32 %v1157_v58, %v2052_v63  ;;  %1592 = vmatpush.xpose.msk.msrb.mxu0 %vm501_vm3, %v1428_v46  ;;  %v1185_v48 = vmul.f32 %v1145_v50, %v2052_v63  ;;  %v1297_v47 = vmul.f32 0.5, %v1296_v60  ;;  %v1405_v58 = vmul.f32 %v2618_v36, %v1385_v62 }
 0x442   :  { %v1338_v51 = vsub.f32 1.5, %v1337_v2  ;;  %v1307_v43 = vmul.f32 0.5, %v1306_v5 }
 0x443   :  { %v1668_v10 = vpop.eup %1667  ;;  %v2661_v7 = vadd.f32 1e-05, %v1189_v14  ;;  %v2684_v30 = vadd.f32 1e-05, %v1185_v48  ;;  %v1298_v3 = vsub.f32 1.5, %v1297_v47 }
 0x444   :  { %v1339_v37 = vmul.f32 %v1662_v31, %v1338_v51  ;;  %v1315_v16 = vmul.f32 %v1668_v10, %v2631_v6  ;;  %v2673_v61 = vpop.eup %1669  ;;  %v1308_v39 = vsub.f32 1.5, %v1307_v43  ;;  %vm1321_vm10 = vweird.f32 %v1668_v10 }
 0x445   :  { %1673 = vrsqrt.f32 %v2661_v7  ;;  %1593 = vmatpush.xpose.msk.msrb.mxu0 %vm501_vm3, %v1427_v15  ;;  %v2686_v22 = vpop.eup %1671  ;;  %v1275_v35 = vmul.f32 %v2673_v61, %v2638_v18  ;;  %vm1322_vm12 = vmor %vm1320_vm9, %vm1321_vm10  ;;  %v1299_v40 = vmul.f32 %v2635_v56, %v1298_v3  ;;  %vm1290_vm2 = vweird.f32 %v2661_v7 }
 0x446   :  { %v1343_v29 = vsel %vm2667_vm6, %v1662_v31, %v1339_v37  ;;  %v1316_v34 = vmul.f32 %v1668_v10, %v1315_v16  ;;  %v1265_v1 = vmul.f32 %v2686_v22, %v2649_v44  ;;  %1675 = vrsqrt.f32 %v2684_v30 }
 0x447   :  { %v1386_v31 = vmul.f32 %v1343_v29, %v2478_v55  ;;  %v1309_v57 = vmul.f32 %v2640_v38, %v1308_v39  ;;  %v1276_v55 = vmul.f32 %v2673_v61, %v1275_v35  ;;  %vm1281_vm4 = vweird.f32 %v2673_v61 }
 0x448   :  { %v1317_v41 = vmul.f32 0.5, %v1316_v34  ;;  %v1148_v13 = vpop.xlane.xlu2 %1147  ;;  %v1266_v17 = vmul.f32 %v2686_v22, %v1265_v1  ;;  %vm1280_vm6 = vweird.f32 %v2638_v18  ;;  %vm1271_vm7 = vweird.f32 %v2686_v22 }
 0x449   :  { %v1186_v45 = vmul.f32 %v1148_v13, %v2052_v63  ;;  %v1406_v42 = vmul.f32 %v2618_v36, %v1386_v31  ;;  %v1313_v50 = vsel %vm2713_vm15, %v2640_v38, %v1309_v57  ;;  %v1277_v14 = vmul.f32 0.5, %v1276_v55  ;;  %vm1282_vm8 = vmor %vm1280_vm6, %vm1281_vm4 }
 0x44a   :  { %v1318_v19 = vsub.f32 1.5, %v1317_v41  ;;  %v1267_v37 = vmul.f32 0.5, %v1266_v17  ;;  %v1383_v43 = vmul.f32 %v1313_v50, %v2488_v28  ;;  %vm1270_vm9 = vweird.f32 %v2649_v44  ;;  %v1136_v17 = vpop.xlane.xlu0 %1135 }
 0x44b   :  { %v1674_v9 = vpop.eup %1673  ;;  %v2698_v52 = vadd.f32 1e-05, %v1186_v45  ;;  %v1426_v6 = vadd.f32 %v2627_v24, %v1406_v42  ;;  %v1278_v16 = vsub.f32 1.5, %v1277_v14  ;;  %vm1272_vm10 = vmor %vm1270_vm9, %vm1271_vm7  ;;  %vm1250_vm15 = vweird.f32 %v2684_v30 }
 0x44c   :  { %v1319_v54 = vmul.f32 %v1668_v10, %v1318_v19  ;;  %v1285_v26 = vmul.f32 %v1674_v9, %v2661_v7  ;;  %v2724_v51 = vpop.eup %1675  ;;  %vm1291_vm1 = vweird.f32 %v1674_v9  ;;  %v1268_v34 = vsub.f32 1.5, %v1267_v37 }
 0x44d   :  { %1677 = vrsqrt.f32 %v2698_v52  ;;  %1594 = vmatpush.xpose.msk.msrb.mxu0 %vm501_vm3, %v1426_v6  ;;  %v1245_v0 = vmul.f32 %v2724_v51, %v2684_v30  ;;  %vm1292_vm5 = vmor %vm1290_vm2, %vm1291_vm1  ;;  %v1403_v28 = vmul.f32 %v2618_v36, %v1383_v43  ;;  %v1279_v39 = vmul.f32 %v2673_v61, %v1278_v16  ;;  %v1431_v43 = vld [vmem:[#allocation2] sm:$0x1] }
 0x44e   :  { %v1323_v46 = vsel %vm1322_vm12, %v1668_v10, %v1319_v54  ;;  %v1286_v2 = vmul.f32 %v1674_v9, %v1285_v26  ;;  %v1303_v10 = vsel %vm2726_vm0, %v2635_v56, %v1299_v40  ;;  %vm1260_vm12 = vweird.f32 %v2698_v52 }
 0x44f   :  { %v1384_v12 = vmul.f32 %v1323_v46, %v2499_v8  ;;  %v1425_v8 = vadd.f32 %v2627_v24, %v1405_v58  ;;  %v1382_v53 = vmul.f32 %v1303_v10, %v2484_v59  ;;  %v1246_v35 = vmul.f32 %v2724_v51, %v1245_v0 }
 0x450   :  { %v1287_v15 = vmul.f32 0.5, %v1286_v2  ;;  %v1423_v7 = vadd.f32 %v2627_v24, %v1403_v28  ;;  %v1269_v59 = vmul.f32 %v2686_v22, %v1268_v34  ;;  %v1283_v3 = vsel %vm1282_vm8, %v2673_v61, %v1279_v39 }
 0x451   :  { %v1404_v48 = vmul.f32 %v2618_v36, %v1384_v12  ;;  %1595 = vmatpush.xpose.msk.msrb.mxu0 %vm501_vm3, %v1425_v8  ;;  %v1402_v45 = vmul.f32 %v2618_v36, %v1382_v53  ;;  %v1247_v19 = vmul.f32 0.5, %v1246_v35  ;;  %v1380_v1 = vmul.f32 %v1283_v3, %v2512_v11 }
 0x452   :  { %v1288_v49 = vsub.f32 1.5, %v1287_v15  ;;  %v1273_v42 = vsel %vm1272_vm10, %v2686_v22, %v1269_v59  ;;  %vm1251_vm14 = vweird.f32 %v2724_v51  ;;  %v1182_v6 = vmul.f32 %v1136_v17, %v2052_v63 }
 0x453   :  { %v1678_v38 = vpop.eup %1677  ;;  %v1424_v56 = vadd.f32 %v2627_v24, %v1404_v48  ;;  %v1422_v18 = vadd.f32 %v2627_v24, %v1402_v45  ;;  %v1400_v44 = vmul.f32 %v2618_v36, %v1380_v1  ;;  %v1379_v54 = vmul.f32 %v1273_v42, %v2505_v27  ;;  %vm1252_vm0 = vmor %vm1250_vm15, %vm1251_vm14 }
 0x454   :  { %v1289_v23 = vmul.f32 %v1674_v9, %v1288_v49  ;;  %v1255_v29 = vmul.f32 %v1678_v38, %v2698_v52  ;;  %vm1261_vm11 = vweird.f32 %v1678_v38  ;;  %v1198_v58 = vadd.f32 1e-05, %v1182_v6 }
 0x455   :  { %1596 = vmatpush.xpose.msk.msrb.mxu0 %vm501_vm3, %v1424_v56  ;;  %vm1262_vm13 = vmor %vm1260_vm12, %vm1261_vm11  ;;  %v1420_v22 = vadd.f32 %v2627_v24, %v1400_v44  ;;  %v1399_v52 = vmul.f32 %v2618_v36, %v1379_v54  ;;  %v1712_v16 = vmov 0  }
 0x456   :  { %v1256_v47 = vmul.f32 %v1678_v38, %v1255_v29  ;;  %v1293_v41 = vsel %vm1292_vm5, %v1674_v9, %v1289_v23  ;;  %1679 = vrsqrt.f32 %v1198_v58  ;;  %1611 = vset.pattern.permute.xlu1 %v1712_v16  ;;  %1612 = vset.pattern.permute.xlu0 %v1712_v16  ;;  %vm1220_vm9 = vweird.f32 %v1198_v58 }
 0x457   :  { %v1381_v31 = vmul.f32 %v1293_v41, %v2523_v33  ;;  %v1248_v33 = vsub.f32 1.5, %v1247_v19  ;;  %v1419_v27 = vadd.f32 %v2627_v24, %v1399_v52  ;;  %1434 = vperm.xlu1 %1611, %v1431_v43  }
 0x458   :  { %v1257_v13 = vmul.f32 0.5, %v1256_v47 }
 0x459   :  { %1597 = vmatpush.xpose.msk.msrb.mxu0 %vm501_vm3, %v1423_v7  ;;  %v1401_v9 = vmul.f32 %v2618_v36, %v1381_v31  ;;  %v1249_v55 = vmul.f32 %v2724_v51, %v1248_v33 }
 0x45a   :  { %v1258_v62 = vsub.f32 1.5, %v1257_v13 }
 0x45b   :  { %v1421_v61 = vadd.f32 %v2627_v24, %v1401_v9  ;;  %v1253_v40 = vsel %vm1252_vm0, %v2724_v51, %v1249_v55 }
 0x45c   :  { %v1259_v57 = vmul.f32 %v1678_v38, %v1258_v62  ;;  %v1377_v2 = vmul.f32 %v1253_v40, %v2527_v32  ;;  %v1680_v12 = vpop.eup %1679 }
 0x45d   :  { %1598 = vmatpush.xpose.msk.msrb.mxu0 %vm501_vm3, %v1422_v18  ;;  %v1215_v49 = vmul.f32 %v1680_v12, %v1198_v58  ;;  %vm1221_vm5 = vweird.f32 %v1680_v12 }
 0x45e   :  { %v1263_v11 = vsel %vm1262_vm13, %v1678_v38, %v1259_v57  ;;  %v1397_v5 = vmul.f32 %v2618_v36, %v1377_v2  ;;  %vm1222_vm10 = vmor %vm1220_vm9, %vm1221_vm5 }
 0x45f   :  { %v1378_v26 = vmul.f32 %v1263_v11, %v2539_v4  ;;  %v1216_v37 = vmul.f32 %v1680_v12, %v1215_v49 }
 0x460   :  { %v1417_v4 = vadd.f32 %v2627_v24, %v1397_v5 }
 0x461   :  { %1599 = vmatpush.xpose.msk.msrb.mxu0 %vm501_vm3, %v1421_v61  ;;  %v1398_v46 = vmul.f32 %v2618_v36, %v1378_v26  ;;  %v1217_v0 = vmul.f32 0.5, %v1216_v37 }
 0x463   :  { %v1418_v30 = vadd.f32 %v2627_v24, %v1398_v46  ;;  %v1218_v34 = vsub.f32 1.5, %v1217_v0 }
 0x465   :  { %1600 = vmatpush.xpose.msk.msrb.mxu0 %vm501_vm3, %v1420_v22  ;;  %v1219_v39 = vmul.f32 %v1680_v12, %v1218_v34 }
 0x467   :  { %v1223_v31 = vsel %vm1222_vm10, %v1680_v12, %v1219_v39 }
 0x468   :  { %v1374_v62 = vmul.f32 %v1223_v31, %v2546_v25 }
 0x469   :  { %1601 = vmatpush.xpose.msk.msrb.mxu0 %vm501_vm3, %v1419_v27 }
 0x46a   :  { %v1394_v9 = vmul.f32 %v2618_v36, %v1374_v62 }
 0x46d   :  { %1602 = vmatpush.xpose.msk.msrb.mxu0 %vm501_vm3, %v1418_v30 }
 0x471   :  { %1603 = vmatpush.xpose.msk.msrb.mxu0 %vm501_vm3, %v1417_v4 }
 0x49b   :  { %v1139_v50 = vpop.xlane.xlu2 %1138 }
 0x49c   :  { %v1183_v14 = vmul.f32 %v1139_v50, %v2052_v63 }
 0x49e   :  { %v1199_v32 = vadd.f32 1e-05, %v1183_v14 }
 0x4a0   :  { %1681 = vrsqrt.f32 %v1199_v32  ;;  %vm1230_vm2 = vweird.f32 %v1199_v32 }
 0x4a3   :  { %v1142_v15 = vpop.xlane.xlu1 %1141 }
 0x4a4   :  { %v1184_v51 = vmul.f32 %v1142_v15, %v2052_v63 }
 0x4a6   :  { %v1682_v60 = vpop.eup %1681  ;;  %v1200_v10 = vadd.f32 1e-05, %v1184_v51 }
 0x4a7   :  { %v1225_v48 = vmul.f32 %v1682_v60, %v1199_v32  ;;  %vm1231_vm1 = vweird.f32 %v1682_v60 }
 0x4a8   :  { %1683 = vrsqrt.f32 %v1200_v10  ;;  %vm1232_vm6 = vmor %vm1230_vm2, %vm1231_vm1  ;;  %vm1240_vm7 = vweird.f32 %v1200_v10 }
 0x4a9   :  { %v1226_v38 = vmul.f32 %v1682_v60, %v1225_v48 }
 0x4ab   :  { %v1227_v8 = vmul.f32 0.5, %v1226_v38 }
 0x4ad   :  { %v1228_v29 = vsub.f32 1.5, %v1227_v8 }
 0x4ae   :  { %v1684_v23 = vpop.eup %1683 }
 0x4af   :  { %v1235_v56 = vmul.f32 %v1684_v23, %v1200_v10  ;;  %v1229_v63 = vmul.f32 %v1682_v60, %v1228_v29  ;;  %vm1241_vm4 = vweird.f32 %v1684_v23 }
 0x4b0   :  { %vm1242_vm8 = vmor %vm1240_vm7, %vm1241_vm4 }
 0x4b1   :  { %v1236_v47 = vmul.f32 %v1684_v23, %v1235_v56  ;;  %v1233_v41 = vsel %vm1232_vm6, %v1682_v60, %v1229_v63 }
 0x4b2   :  { %v1375_v45 = vmul.f32 %v1233_v41, %v2563_v21  ;;  %v1430_v21 = vld [vmem:[%s2816_s9] sm:$0x1] }
 0x4b3   :  { %v1237_v28 = vmul.f32 0.5, %v1236_v47 }
 0x4b4   :  { %v1395_v19 = vmul.f32 %v2618_v36, %v1375_v45 }
 0x4b5   :  { %v1238_v53 = vsub.f32 1.5, %v1237_v28 }
 0x4b6   :  { %v1415_v18 = vadd.f32 %v2627_v24, %v1395_v19 }
 0x4b7   :  { %v1239_v35 = vmul.f32 %v1684_v23, %v1238_v53 }
 0x4b9   :  { %v1243_v13 = vsel %vm1242_vm8, %v1684_v23, %v1239_v35 }
 0x4ba   :  { %v1376_v7 = vmul.f32 %v1243_v13, %v2573_v20  ;;  %v1414_v20 = vadd.f32 %v2627_v24, %v1394_v9 }
 0x4bc   :  { %v1396_v59 = vmul.f32 %v2618_v36, %v1376_v7 }
 0x4be   :  { %v1416_v3 = vadd.f32 %v2627_v24, %v1396_v59 }
 0x4c0   :  { %1604 = vmatpush.xpose.msk.msrb.mxu0 %vm501_vm3, %v1416_v3 }
 0x4c4   :  { %1605 = vmatpush.xpose.msk.msrb.mxu0 %vm501_vm3, %v1415_v18 }
 0x4c8   :  { %1606 = vmatpush.xpose.msk.msrb.mxu0 %vm501_vm3, %v1414_v20 }
 0x4c9   :  { %v1435_v1 = vpop.permute.xlu1 %1434 }
 0x4ca   :  { %v1437_v25 = vperm.slane %v1435_v1, 0 }
 0x4cb   :  { %1607 = vmatmul.msk.f32.vlgmr.msrb.gmra.mxu0 %vm501_vm3, %v1430_v21 }
 0x548   :  { %v1506_v36 = vpop.f32.mrf.mxu0 }
 0x549   :  { %v1507_v42 = vadd.f32 %v1506_v36, %v1437_v25 }
 0x54b   :  { %1509 = vst [vmem:[#allocation3] sm:$0x1] %v1507_v42 }
 0x54c   :  { %1520 = dma.vmem_to_hbm [thread:$0]  %s1516_s20, 16, %s1518_s23, [#allocation4]  }
 0x54d   :  { %1709 = dma.done.wait [#allocation4], 16  }
 0x54e   :  { %1710 = vsyncadd [#allocation4], 4294967280 }
 0x54f   :  { %1525 = vsyncpa [#allocation4], 1 }

</bundles_post_ra>
